<compile_context>
chip_gen: v6e
topology: v6e:2x2x1
jax: 0.10.0
libtpu: 0.0.40
codegen_flags: <defaults>
</compile_context>

<pallas_src>
import functools

import jax
import jax.numpy as jnp
from jax import lax
from jax.experimental import pallas as pl
from jax.experimental.pallas import tpu as pltpu


def appnp_kernel(x_ref, w1t_ref, b1_ref, w2t_ref, b2_ref, a_ref, o_ref,
                 *, K: int, alpha: float, num_classes: int):
    # lin1 (bf16 MXU operands, f32 accumulation) + relu.
    h1 = jnp.dot(x_ref[...], w1t_ref[...], preferred_element_type=jnp.float32)
    h1 = jnp.maximum(h1 + b1_ref[...], 0.0)

    # lin2 into the lane-padded class dimension CP (>= 128).
    z0 = jnp.dot(h1.astype(jnp.bfloat16), w2t_ref[...],
                 preferred_element_type=jnp.float32)
    z0 = z0 + b2_ref[...]

    # APPNP propagation.  a_ref already carries the (1 - alpha) factor
    # (folded into the normalization in the wrapper); alpha*z0 is hoisted.
    az0 = alpha * z0
    a = a_ref[...]

    def body(_, z):
        return jnp.dot(a, z, preferred_element_type=jnp.float32) + az0

    # K is static -> fully unrolled so the LLO scheduler sees every matmul.
    z = lax.fori_loop(0, K, body, z0, unroll=True)

    # log_softmax over the real classes only: mask the padded lanes so they do
    # not affect the max / exp-sum normalizer.
    col = lax.broadcasted_iota(jnp.int32, z.shape, 1)
    z = jnp.where(col < num_classes, z, jnp.float32(-1e30))
    m = jnp.max(z, axis=1, keepdims=True)
    shifted = z - m
    lse = jnp.log(jnp.sum(jnp.exp(shifted), axis=1, keepdims=True))
    o_ref[...] = (shifted - lse).astype(o_ref.dtype)


def appnp_net_forward(x, w1, b1, w2, b2, edge_index, *, K=10, alpha=0.1):
    """Build gcn-normalized dense adjacency (JAX glue), run the Pallas kernel.

    w1: [H, F]   w2: [C, H]   (PyTorch nn.Linear weight layout: [out, in])
    """
    N, F = x.shape
    H = w1.shape[0]
    C = w2.shape[0]
    CP = max(128, ((C + 127) // 128) * 128)   # lane-dense padded class dim

    # Dense adjacency with self-loops, symmetric normalization (gcn_norm),
    # with the APPNP (1 - alpha) factor folded into the matrix.
    adj = jnp.zeros((N, N), jnp.float32)
    adj = adj.at[edge_index[0], edge_index[1]].set(1.0)
    adj = adj + jnp.eye(N, dtype=jnp.float32)            # add self loops
    deg = jnp.sum(adj, axis=1)
    d_inv_sqrt = jnp.where(deg > 0, lax.rsqrt(deg), 0.0)
    a_scaled = (1.0 - alpha) * (d_inv_sqrt[:, None] * adj * d_inv_sqrt[None, :])

    # bf16 operands for the linear layers; zero-padded class dimension.
    x_bf = x.astype(jnp.bfloat16)
    w1t_bf = w1.T.astype(jnp.bfloat16)
    w2t_pad = jnp.zeros((H, CP), jnp.bfloat16).at[:, :C].set(
        w2.T.astype(jnp.bfloat16))
    b2_pad = jnp.zeros((1, CP), jnp.float32).at[:, :C].set(b2)
    b1_row = b1[None, :].astype(jnp.float32)

    flops = 2 * N * F * H + 2 * N * H * CP + K * 2 * N * N * CP
    bytes_accessed = int(
        x_bf.size * 2 + w1t_bf.size * 2 + b1_row.size * 4
        + w2t_pad.size * 2 + b2_pad.size * 4
        + a_scaled.size * 4 + N * CP * 4)
    cost = pl.CostEstimate(flops=int(flops),
                           transcendentals=int(N * CP),
                           bytes_accessed=bytes_accessed)

    kernel = functools.partial(appnp_kernel, K=int(K), alpha=float(alpha),
                               num_classes=int(C))

    # Single-block kernel: all operands fit VMEM at these sizes (A is 64 KiB).
    # For N in the thousands, switch A to memory_space=pl.ANY + a row-block
    # grid ("parallel" on the node axis for v7x's 2 TCs).
    out_pad = pl.pallas_call(
        kernel,
        out_shape=jax.ShapeDtypeStruct((N, CP), jnp.float32),
        in_specs=[
            pl.BlockSpec(memory_space=pltpu.MemorySpace.VMEM),  # x      [N, F]  bf16
            pl.BlockSpec(memory_space=pltpu.MemorySpace.VMEM),  # w1^T   [F, H]  bf16
            pl.BlockSpec(memory_space=pltpu.MemorySpace.VMEM),  # b1     [1, H]  f32
            pl.BlockSpec(memory_space=pltpu.MemorySpace.VMEM),  # w2^T   [H, CP] bf16
            pl.BlockSpec(memory_space=pltpu.MemorySpace.VMEM),  # b2     [1, CP] f32
            pl.BlockSpec(memory_space=pltpu.MemorySpace.VMEM),  # A_hat  [N, N]  f32
        ],
        out_specs=pl.BlockSpec(memory_space=pltpu.MemorySpace.VMEM),
        cost_estimate=cost,
    )(x_bf, w1t_bf, b1_row, w2t_pad, b2_pad, a_scaled)

    return out_pad[:, :C]


def _reference(x, w1, b1, w2, b2, edge_index, *, K=10, alpha=0.1):
    """Pure-JAX reference mirroring the kernel's precision choices
    (bf16 MXU inputs for lin1/lin2, f32 propagation)."""
    N = x.shape[0]
    adj = jnp.zeros((N, N), jnp.float32)
    adj = adj.at[edge_index[0], edge_index[1]].set(1.0)
    adj = adj + jnp.eye(N, dtype=jnp.float32)
    deg = jnp.sum(adj, axis=1)
    d_inv_sqrt = jnp.where(deg > 0, lax.rsqrt(deg), 0.0)
    a_hat = d_inv_sqrt[:, None] * adj * d_inv_sqrt[None, :]

    h = jnp.dot(x.astype(jnp.bfloat16), w1.T.astype(jnp.bfloat16),
                preferred_element_type=jnp.float32) + b1
    h = jnp.maximum(h, 0.0)
    z0 = jnp.dot(h.astype(jnp.bfloat16), w2.T.astype(jnp.bfloat16),
                 preferred_element_type=jnp.float32) + b2
    z = z0
    for _ in range(K):
        z = (1.0 - alpha) * (a_hat @ z) + alpha * z0
    return jax.nn.log_softmax(z, axis=1)


if __name__ == "__main__":
    # Small, deterministic problem: N nodes, F features, H hidden, C classes.
    N, F, H, C = 128, 64, 64, 16
    K, ALPHA = 10, 0.1

    key = jax.random.PRNGKey(0)
    kx, ke, kw1, kb1, kw2, kb2 = jax.random.split(key, 6)

    x = jax.random.normal(kx, (N, F), dtype=jnp.float32)

    # Deterministic synthetic edge_index [2, E]: random directed edges.
    E = 512
    src = jax.random.randint(ke, (E,), 0, N)
    dst = jnp.roll(src, 7) ^ 3  # deterministic mixing to avoid pure self-edges
    dst = jnp.clip(dst, 0, N - 1)
    edge_index = jnp.stack([src, dst], axis=0)

    # PyTorch nn.Linear default init: U(-1/sqrt(fan_in), 1/sqrt(fan_in)).
    bound1 = 1.0 / (F ** 0.5)
    w1 = jax.random.uniform(kw1, (H, F), jnp.float32, -bound1, bound1)
    b1 = jax.random.uniform(kb1, (H,), jnp.float32, -bound1, bound1)
    bound2 = 1.0 / (H ** 0.5)
    w2 = jax.random.uniform(kw2, (C, H), jnp.float32, -bound2, bound2)
    b2 = jax.random.uniform(kb2, (C,), jnp.float32, -bound2, bound2)

    # TODO(synk): F.dropout(training=True) not implemented; forward runs in
    # eval mode where dropout is the identity.

    out = appnp_net_forward(x, w1, b1, w2, b2, edge_index, K=K, alpha=ALPHA)
    out = jax.block_until_ready(out)

    ref = _reference(x, w1, b1, w2, b2, edge_index, K=K, alpha=ALPHA)
    assert out.shape == (N, C)
    assert jnp.allclose(out, ref, atol=2e-3, rtol=2e-3), "mismatch vs reference"

    print("KERNEL_OK")
</pallas_src>

<mosaic_0001>
module attributes {stable_mosaic.version = 11 : i64} {
  func.func @appnp_kernel(%arg0: memref<128x64xbf16, #tpu.memory_space<vmem>>, %arg1: memref<64x64xbf16, #tpu.memory_space<vmem>>, %arg2: memref<1x64xf32, #tpu.memory_space<vmem>>, %arg3: memref<64x128xbf16, #tpu.memory_space<vmem>>, %arg4: memref<1x128xf32, #tpu.memory_space<vmem>>, %arg5: memref<128x128xf32, #tpu.memory_space<vmem>>, %arg6: memref<128x128xf32, #tpu.memory_space<vmem>>) attributes {dimension_semantics = [], scalar_prefetch = 0 : i64, scratch_operands = 0 : i64, tpu.core_type = #tpu.core_type<tc>} {
    %c0 = arith.constant 0 : index
    %c0_0 = arith.constant 0 : index
    %0 = vector.load %arg0[%c0, %c0_0] : memref<128x64xbf16, #tpu.memory_space<vmem>>, vector<128x64xbf16>
    %c0_1 = arith.constant 0 : index
    %c0_2 = arith.constant 0 : index
    %1 = vector.load %arg1[%c0_1, %c0_2] : memref<64x64xbf16, #tpu.memory_space<vmem>>, vector<64x64xbf16>
    %cst = arith.constant dense<0.000000e+00> : vector<128x64xf32>
    %2 = tpu.matmul %0, %1, %cst {dimension_numbers = #tpu.dot_dimension_numbers<[1], [0], [0], [1], [0, 0, 1, 1], [], []>} : vector<128x64xbf16>, vector<64x64xbf16>, vector<128x64xf32> -> vector<128x64xf32>
    %c0_3 = arith.constant 0 : index
    %c0_4 = arith.constant 0 : index
    %3 = vector.load %arg2[%c0_3, %c0_4] : memref<1x64xf32, #tpu.memory_space<vmem>>, vector<1x64xf32>
    %4 = vector.broadcast %3 : vector<1x64xf32> to vector<128x64xf32>
    %5 = arith.addf %2, %4 : vector<128x64xf32>
    %cst_5 = arith.constant 0.000000e+00 : f32
    %6 = vector.broadcast %cst_5 : f32 to vector<128x64xf32>
    %7 = arith.maximumf %5, %6 : vector<128x64xf32>
    %8 = arith.truncf %7 : vector<128x64xf32> to vector<128x64xbf16>
    %c0_6 = arith.constant 0 : index
    %c0_7 = arith.constant 0 : index
    %9 = vector.load %arg3[%c0_6, %c0_7] : memref<64x128xbf16, #tpu.memory_space<vmem>>, vector<64x128xbf16>
    %cst_8 = arith.constant dense<0.000000e+00> : vector<128x128xf32>
    %10 = tpu.matmul %8, %9, %cst_8 {dimension_numbers = #tpu.dot_dimension_numbers<[1], [0], [0], [1], [0, 0, 1, 1], [], []>} : vector<128x64xbf16>, vector<64x128xbf16>, vector<128x128xf32> -> vector<128x128xf32>
    %c0_9 = arith.constant 0 : index
    %c0_10 = arith.constant 0 : index
    %11 = vector.load %arg4[%c0_9, %c0_10] : memref<1x128xf32, #tpu.memory_space<vmem>>, vector<1x128xf32>
    %12 = vector.broadcast %11 : vector<1x128xf32> to vector<128x128xf32>
    %13 = arith.addf %10, %12 : vector<128x128xf32>
    %cst_11 = arith.constant 1.000000e-01 : f32
    %14 = vector.broadcast %cst_11 : f32 to vector<128x128xf32>
    %15 = arith.mulf %14, %13 : vector<128x128xf32>
    %c0_12 = arith.constant 0 : index
    %c0_13 = arith.constant 0 : index
    %16 = vector.load %arg5[%c0_12, %c0_13] : memref<128x128xf32, #tpu.memory_space<vmem>>, vector<128x128xf32>
    %c0_i32 = arith.constant 0 : i32
    %cst_14 = arith.constant dense<0.000000e+00> : vector<128x128xf32>
    %17 = tpu.matmul %16, %13, %cst_14 {dimension_numbers = #tpu.dot_dimension_numbers<[1], [0], [0], [1], [0, 0, 1, 1], [], []>} : vector<128x128xf32>, vector<128x128xf32>, vector<128x128xf32> -> vector<128x128xf32>
    %18 = arith.addf %17, %15 : vector<128x128xf32>
    %c1_i32 = arith.constant 1 : i32
    %cst_15 = arith.constant dense<0.000000e+00> : vector<128x128xf32>
    %19 = tpu.matmul %16, %18, %cst_15 {dimension_numbers = #tpu.dot_dimension_numbers<[1], [0], [0], [1], [0, 0, 1, 1], [], []>} : vector<128x128xf32>, vector<128x128xf32>, vector<128x128xf32> -> vector<128x128xf32>
    %20 = arith.addf %19, %15 : vector<128x128xf32>
    %c2_i32 = arith.constant 2 : i32
    %cst_16 = arith.constant dense<0.000000e+00> : vector<128x128xf32>
    %21 = tpu.matmul %16, %20, %cst_16 {dimension_numbers = #tpu.dot_dimension_numbers<[1], [0], [0], [1], [0, 0, 1, 1], [], []>} : vector<128x128xf32>, vector<128x128xf32>, vector<128x128xf32> -> vector<128x128xf32>
    %22 = arith.addf %21, %15 : vector<128x128xf32>
    %c3_i32 = arith.constant 3 : i32
    %cst_17 = arith.constant dense<0.000000e+00> : vector<128x128xf32>
    %23 = tpu.matmul %16, %22, %cst_17 {dimension_numbers = #tpu.dot_dimension_numbers<[1], [0], [0], [1], [0, 0, 1, 1], [], []>} : vector<128x128xf32>, vector<128x128xf32>, vector<128x128xf32> -> vector<128x128xf32>
    %24 = arith.addf %23, %15 : vector<128x128xf32>
    %c4_i32 = arith.constant 4 : i32
    %cst_18 = arith.constant dense<0.000000e+00> : vector<128x128xf32>
    %25 = tpu.matmul %16, %24, %cst_18 {dimension_numbers = #tpu.dot_dimension_numbers<[1], [0], [0], [1], [0, 0, 1, 1], [], []>} : vector<128x128xf32>, vector<128x128xf32>, vector<128x128xf32> -> vector<128x128xf32>
    %26 = arith.addf %25, %15 : vector<128x128xf32>
    %c5_i32 = arith.constant 5 : i32
    %cst_19 = arith.constant dense<0.000000e+00> : vector<128x128xf32>
    %27 = tpu.matmul %16, %26, %cst_19 {dimension_numbers = #tpu.dot_dimension_numbers<[1], [0], [0], [1], [0, 0, 1, 1], [], []>} : vector<128x128xf32>, vector<128x128xf32>, vector<128x128xf32> -> vector<128x128xf32>
    %28 = arith.addf %27, %15 : vector<128x128xf32>
    %c6_i32 = arith.constant 6 : i32
    %cst_20 = arith.constant dense<0.000000e+00> : vector<128x128xf32>
    %29 = tpu.matmul %16, %28, %cst_20 {dimension_numbers = #tpu.dot_dimension_numbers<[1], [0], [0], [1], [0, 0, 1, 1], [], []>} : vector<128x128xf32>, vector<128x128xf32>, vector<128x128xf32> -> vector<128x128xf32>
    %30 = arith.addf %29, %15 : vector<128x128xf32>
    %c7_i32 = arith.constant 7 : i32
    %cst_21 = arith.constant dense<0.000000e+00> : vector<128x128xf32>
    %31 = tpu.matmul %16, %30, %cst_21 {dimension_numbers = #tpu.dot_dimension_numbers<[1], [0], [0], [1], [0, 0, 1, 1], [], []>} : vector<128x128xf32>, vector<128x128xf32>, vector<128x128xf32> -> vector<128x128xf32>
    %32 = arith.addf %31, %15 : vector<128x128xf32>
    %c8_i32 = arith.constant 8 : i32
    %cst_22 = arith.constant dense<0.000000e+00> : vector<128x128xf32>
    %33 = tpu.matmul %16, %32, %cst_22 {dimension_numbers = #tpu.dot_dimension_numbers<[1], [0], [0], [1], [0, 0, 1, 1], [], []>} : vector<128x128xf32>, vector<128x128xf32>, vector<128x128xf32> -> vector<128x128xf32>
    %34 = arith.addf %33, %15 : vector<128x128xf32>
    %c9_i32 = arith.constant 9 : i32
    %cst_23 = arith.constant dense<0.000000e+00> : vector<128x128xf32>
    %35 = tpu.matmul %16, %34, %cst_23 {dimension_numbers = #tpu.dot_dimension_numbers<[1], [0], [0], [1], [0, 0, 1, 1], [], []>} : vector<128x128xf32>, vector<128x128xf32>, vector<128x128xf32> -> vector<128x128xf32>
    %36 = arith.addf %35, %15 : vector<128x128xf32>
    %37 = tpu.iota {dimensions = array<i32: 1>} : vector<128x128xi32>
    %c16_i32 = arith.constant 16 : i32
    %38 = vector.broadcast %c16_i32 : i32 to vector<128x128xi32>
    %39 = arith.cmpi slt, %37, %38 : vector<128x128xi32>
    %cst_24 = arith.constant -1.000000e+30 : f32
    %40 = vector.broadcast %cst_24 : f32 to vector<128x128xf32>
    %41 = arith.select %39, %36, %40 : vector<128x128xi1>, vector<128x128xf32>
    %cst_25 = arith.constant dense<0xFF800000> : vector<128xf32>
    %42 = vector.multi_reduction <maximumf>, %41, %cst_25 [1] : vector<128x128xf32> to vector<128xf32>
    %43 = vector.shape_cast %42 : vector<128xf32> to vector<128x1xf32>
    %44 = vector.broadcast %43 : vector<128x1xf32> to vector<128x128xf32>
    %45 = arith.subf %41, %44 : vector<128x128xf32>
    %46 = math.exp %45 : vector<128x128xf32>
    %cst_26 = arith.constant dense<0.000000e+00> : vector<128xf32>
    %47 = vector.multi_reduction <add>, %46, %cst_26 [1] : vector<128x128xf32> to vector<128xf32>
    %48 = vector.shape_cast %47 : vector<128xf32> to vector<128x1xf32>
    %49 = math.log %48 : vector<128x1xf32>
    %50 = vector.broadcast %49 : vector<128x1xf32> to vector<128x128xf32>
    %51 = arith.subf %45, %50 : vector<128x128xf32>
    %c0_27 = arith.constant 0 : index
    %c0_28 = arith.constant 0 : index
    %52 = vector.load %arg6[%c0_27, %c0_28] : memref<128x128xf32, #tpu.memory_space<vmem>>, vector<128x128xf32>
    tpu.vector_store %arg6[%c0_27, %c0_28], %51 {strides = array<i32>} : memref<128x128xf32, #tpu.memory_space<vmem>>, vector<128x128xf32>,
    return
  }
}

</mosaic_0001>

<bundles_post_ra>
// kernel: tpu_custom_call.1
= control target key start
LH: loop header
LB: loop body
LE: loop exit
PB: predicated region body
PF: predicated region fallthrough
CT: control target
= control target key end

     0   :  { %11 = vsyncpa [#allocation3], 0  ;;  %s4005_s0 = inlined_call_operand.vmem [shape: bf16[128,64], index: 0, kind: input, shape index: {}]   ;;  %s4006_s1 = inlined_call_operand.vmem [shape: bf16[64,64], index: 1, kind: input, shape index: {}]   ;;  %s4007_s2 = inlined_call_operand.vmem [shape: f32[1,64], index: 2, kind: input, shape index: {}]   ;;  %s4008_s3 = inlined_call_operand.vmem [shape: bf16[64,128], index: 3, kind: input, shape index: {}]   ;;  %s4009_s4 = inlined_call_operand.vmem [shape: f32[1,128], index: 4, kind: input, shape index: {}]   ;;  %s4010_s5 = inlined_call_operand.hbm [shape: f32[128,128], index: 5, kind: input, shape index: {}]   ;;  %s4011_s6 = inlined_call_operand.hbm [shape: f32[128,128], index: 6, kind: output, shape index: {}]  }
   0x1   :  { %12 = vsyncpa [#allocation4], 0  ;;  %s3264_s21 = smov [#allocation2]  }
   0x2   :  { %s28_s22 = sshll.u32 %s3264_s21, 4  ;;  %s29_s22 = int_to_ptr.vmem [resolvable:$true] %s28_s22 }
   0x3   :  { %s3228_s23 = scalar_lea.vmem %s29_s22, 2048  ;;  %p3233_p1 = scmp.lt.s32.totalorder %s29_s22, %s29_s22 }
   0x4   :  { %p3229_p0 = scmp.ne.s32.totalorder %s29_s22, %s3228_s23  ;;  %p3234_p2 = scmp.lt.s32.totalorder %s3228_s23, %s3228_s23 }
   0x6   :  { %p3235_p3 = por %p3234_p2, %p3233_p1 }
   0x8   :  { %p3236_p4 = pnand %p3235_p3, %p3229_p0 }
   0xa   :  { %3239 = shalt.err (!%p3236_p4)
}
   0xb   :  { %s3265_s24 = smov 128   ;;  %s3266_s25 = smov 8  }
   0xc   :  { %34 = dma.hbm_to_vmem [thread:$0]  %s4010_s5, 2048, %s29_s22, [#allocation3], %s3265_s24, %s3265_s24, %s3266_s25  }
   0xd   :  { %3260 = dma.done.wait [#allocation3], 2048  }
   0xe   :  { %3261 = vsyncadd [#allocation3], 4294965248  ;;  %v3124_v0 = vld [vmem:[%s4006_s1 + $0x18] sm:$0xff]   ;;  %v3125_v1 = vld [vmem:[%s4006_s1 + $0x10] sm:$0xff]   ;;  %vm134_vm0 = vcmask 523264  }
   0xf   :  { %2512 = vmatprep.subr.bf16.mxu0 %v3124_v0  ;;  %v3126_v2 = vld [vmem:[%s4006_s1 + $0x8] sm:$0xff]   ;;  %v3128_v3 = vld [vmem:[%s4005_s0] sm:$0xff]   ;;  %v3136_v6 = vld [vmem:[%s4008_s3 + $0x18] sm:$0xff]  }
  0x10   :  { %2513 = vmatpush3.bf16.msra.mxu0 %v3124_v0  ;;  %2520 = vmatprep.mubr.msk.bf16.mxu0 %vm134_vm0, %v3128_v3  ;;  %v3127_v4 = vld [vmem:[%s4006_s1] sm:$0xff]   ;;  %v3129_v5 = vld [vmem:[%s4005_s0 + $0x8] sm:$0xff]   ;;  %v3130_v7 = vld [vmem:[%s4005_s0 + $0x10] sm:$0xff]  }
  0x11   :  { %2514 = vmatprep.subr.bf16.mxu0 %v3125_v1  ;;  %2536 = vmatprep.subr.bf16.mxu1 %v3136_v6  ;;  %v3131_v8 = vld [vmem:[%s4005_s0 + $0x18] sm:$0xff]   ;;  %v3132_v9 = vld [vmem:[%s4005_s0 + $0x20] sm:$0xff]   ;;  %v3133_v10 = vld [vmem:[%s4005_s0 + $0x28] sm:$0xff]  }
  0x12   :  { %2537 = vmatpush3.bf16.msra.mxu1 %v3136_v6  ;;  %v3134_v11 = vld [vmem:[%s4005_s0 + $0x30] sm:$0xff]   ;;  %v3135_v12 = vld [vmem:[%s4005_s0 + $0x38] sm:$0xff]   ;;  %v3138_v14 = vld [vmem:[%s4008_s3 + $0x8] sm:$0xff]  }
  0x13   :  { %v3137_v13 = vld [vmem:[%s4008_s3 + $0x10] sm:$0xff]   ;;  %v3139_v15 = vld [vmem:[%s4008_s3] sm:$0xff]  }
  0x14   :  { %2515 = vmatpush3.bf16.msra.mxu0 %v3125_v1  ;;  %2538 = vmatprep.subr.bf16.mxu1 %v3137_v13  ;;  %v2134_v18 = vld [vmem:[%s4007_s2] ss:$0 sm:$0xff] }
  0x15   :  { %2516 = vmatprep.subr.bf16.mxu0 %v3126_v2 }
  0x16   :  { %2539 = vmatpush3.bf16.msra.mxu1 %v3137_v13 }
  0x17   :  { %2540 = vmatprep.subr.bf16.mxu1 %v3138_v14 }
  0x18   :  { %2517 = vmatpush3.bf16.msra.mxu0 %v3126_v2 }
  0x19   :  { %2518 = vmatprep.subr.bf16.mxu0 %v3127_v4 }
  0x1a   :  { %2541 = vmatpush3.bf16.msra.mxu1 %v3138_v14 }
  0x1b   :  { %2542 = vmatprep.subr.bf16.mxu1 %v3139_v15 }
  0x1c   :  { %2519 = vmatpush3.bf16.msra.mxu0 %v3127_v4 }
  0x1e   :  { %2543 = vmatpush3.bf16.msra.mxu1 %v3139_v15 }
  0x1f   :  { %2521 = vmatmul.mubr.msk.bf16.vlgmr.msra.gmra.mxu0 %vm134_vm0, %v3129_v5 }
  0x20   :  { %2524 = vmatprep.mubr.msk.bf16.mxu0 %vm134_vm0, %v3130_v7 }
  0x27   :  { %2525 = vmatmul.mubr.msk.bf16.gmra.mxu0 %vm134_vm0, %v3131_v8 }
  0x28   :  { %2528 = vmatprep.mubr.msk.bf16.mxu0 %vm134_vm0, %v3132_v9  ;;  %v3376_v9 = vld [vmem:[#allocation2] sm:$0xff] }
  0x2f   :  { %2529 = vmatmul.mubr.msk.bf16.gmra.mxu0 %vm134_vm0, %v3133_v10 }
  0x30   :  { %2532 = vmatprep.mubr.msk.bf16.mxu0 %vm134_vm0, %v3134_v11 }
  0x37   :  { %2533 = vmatmul.mubr.msk.bf16.gmra.mxu0 %vm134_vm0, %v3135_v12 }
  0x38   :  { %2592 = vmatprep.mubr.f32.mxu0 %v3376_v9 }
  0xdf   :  { %v2522_v16 = vpop.f32.mrf.mxu0 }
  0xe0   :  { %v202_v22 = vadd.f32 %v2522_v16, %v2134_v18 }
  0xe1   :  { %v193_v17 = vpop.f32.mrf.mxu0 }
  0xe2   :  { %v194_v20 = vadd.f32 %v2134_v18, %v193_v17  ;;  %v258_v29 = vmax.f32 %v202_v22, 0.0 }
  0xe3   :  { %v2523_v19 = vpop.f32.mrf.mxu0 }
  0xe4   :  { %v205_v21 = vadd.f32 %v2523_v19, %v2134_v18  ;;  %v256_v27 = vmax.f32 %v194_v20, 0.0 }
  0xe5   :  { %v196_v23 = vpop.f32.mrf.mxu0 }
  0xe6   :  { %v197_v24 = vadd.f32 %v2134_v18, %v196_v23  ;;  %v259_v25 = vmax.f32 %v205_v21, 0.0 }
  0xe7   :  { %v2526_v26 = vpop.f32.mrf.mxu0 }
  0xe8   :  { %v257_v28 = vmax.f32 %v197_v24, 0.0  ;;  %v273_v32 = vpack.c.bf16 %v259_v25, %v258_v29  ;;  %v218_v36 = vadd.f32 %v2526_v26, %v2134_v18  ;;  %v2155_v24 = vld [vmem:[%s4009_s4] ss:$0 sm:$0xff]  ;;  %s3267_s4 = smov [#allocation5]  }
  0xe9   :  { %v209_v30 = vpop.f32.mrf.mxu0  ;;  %s2122_s12 = sshll.u32 %s3267_s4, 4  ;;  %s2123_s12 = int_to_ptr.vmem [resolvable:$true] %s2122_s12 }
  0xea   :  { %v272_v31 = vpack.c.bf16 %v257_v28, %v256_v27  ;;  %v210_v34 = vadd.f32 %v2134_v18, %v209_v30  ;;  %v262_v43 = vmax.f32 %v218_v36, 0.0  ;;  %s3240_s13 = scalar_lea.vmem %s2123_s12, 2048  ;;  %p3245_p6 = scmp.lt.s32.totalorder %s2123_s12, %s2123_s12 }
  0xeb   :  { %v2527_v33 = vpop.f32.mrf.mxu0  ;;  %p3241_p5 = scmp.ne.s32.totalorder %s2123_s12, %s3240_s13  ;;  %p3246_p7 = scmp.lt.s32.totalorder %s3240_s13, %s3240_s13 }
  0xec   :  { %v221_v35 = vadd.f32 %v2527_v33, %v2134_v18  ;;  %2544 = vmatprep.mubr.msk.bf16.mxu1 %vm134_vm0, %v272_v31  ;;  %v260_v41 = vmax.f32 %v210_v34, 0.0 }
  0xed   :  { %v212_v37 = vpop.f32.mrf.mxu0  ;;  %2545 = vmatmul.mubr.msk.bf16.vlgmr.msra.gmra.mxu1 %vm134_vm0, %v273_v32  ;;  %p3247_p8 = por %p3246_p7, %p3245_p6 }
  0xee   :  { %v213_v38 = vadd.f32 %v2134_v18, %v212_v37  ;;  %v263_v39 = vmax.f32 %v221_v35, 0.0 }
  0xef   :  { %v2530_v40 = vpop.f32.mrf.mxu0  ;;  %p3248_p9 = pnand %p3247_p8, %p3241_p5 }
  0xf0   :  { %v261_v42 = vmax.f32 %v213_v38, 0.0  ;;  %v275_v46 = vpack.c.bf16 %v263_v39, %v262_v43  ;;  %v234_v50 = vadd.f32 %v2530_v40, %v2134_v18  ;;  %v3445_v43 = vld [vmem:[#allocation2 + $0x8] sm:$0xff] }
  0xf1   :  { %v225_v44 = vpop.f32.mrf.mxu0 }
  0xf2   :  { %v274_v45 = vpack.c.bf16 %v261_v42, %v260_v41  ;;  %v226_v48 = vadd.f32 %v2134_v18, %v225_v44  ;;  %v266_v57 = vmax.f32 %v234_v50, 0.0  ;;  %v3448_v44 = vld [vmem:[#allocation2 + $0x10] sm:$0xff]  ;;  %v3467_v50 = vld [vmem:[#allocation2 + $0x40] sm:$0xff] }
  0xf3   :  { %v2531_v47 = vpop.f32.mrf.mxu0 }
  0xf4   :  { %v237_v49 = vadd.f32 %v2531_v47, %v2134_v18  ;;  %2548 = vmatprep.mubr.msk.bf16.mxu1 %vm134_vm0, %v274_v45  ;;  %v264_v55 = vmax.f32 %v226_v48, 0.0  ;;  %v3453_v45 = vld [vmem:[#allocation2 + $0x18] sm:$0xff]  ;;  %v3459_v47 = vld [vmem:[#allocation2 + $0x28] sm:$0xff]  ;;  %v3461_v48 = vld [vmem:[#allocation2 + $0x30] sm:$0xff] }
  0xf5   :  { %v228_v51 = vpop.f32.mrf.mxu0  ;;  %2549 = vmatmul.mubr.msk.bf16.gmra.mxu1 %vm134_vm0, %v275_v46  ;;  %v3455_v46 = vld [vmem:[#allocation2 + $0x20] sm:$0xff] }
  0xf6   :  { %v229_v52 = vadd.f32 %v2134_v18, %v228_v51  ;;  %v267_v53 = vmax.f32 %v237_v49, 0.0  ;;  %v3465_v49 = vld [vmem:[#allocation2 + $0x38] sm:$0xff]  ;;  %v3471_v51 = vld [vmem:[#allocation2 + $0x48] sm:$0xff] }
  0xf7   :  { %v2534_v54 = vpop.f32.mrf.mxu0 }
  0xf8   :  { %v265_v56 = vmax.f32 %v229_v52, 0.0  ;;  %v277_v60 = vpack.c.bf16 %v267_v53, %v266_v57  ;;  %v250_v0 = vadd.f32 %v2534_v54, %v2134_v18  ;;  %v3473_v52 = vld [vmem:[#allocation2 + $0x50] sm:$0xff]  ;;  %v3477_v53 = vld [vmem:[#allocation2 + $0x58] sm:$0xff]  ;;  %v3479_v54 = vld [vmem:[#allocation2 + $0x60] sm:$0xff] }
  0xf9   :  { %v241_v58 = vpop.f32.mrf.mxu0  ;;  %v3489_v57 = vld [vmem:[#allocation2 + $0x78] sm:$0xff] }
  0xfa   :  { %v276_v59 = vpack.c.bf16 %v265_v56, %v264_v55  ;;  %v242_v62 = vadd.f32 %v2134_v18, %v241_v58  ;;  %v270_v6 = vmax.f32 %v250_v0, 0.0  ;;  %v3483_v55 = vld [vmem:[#allocation2 + $0x68] sm:$0xff]  ;;  %v3485_v56 = vld [vmem:[#allocation2 + $0x70] sm:$0xff] }
  0xfb   :  { %v2535_v61 = vpop.f32.mrf.mxu0 }
  0xfc   :  { %v253_v63 = vadd.f32 %v2535_v61, %v2134_v18  ;;  %2552 = vmatprep.mubr.msk.bf16.mxu1 %vm134_vm0, %v276_v59  ;;  %v268_v4 = vmax.f32 %v242_v62, 0.0 }
  0xfd   :  { %v244_v1 = vpop.f32.mrf.mxu0  ;;  %2553 = vmatmul.mubr.msk.bf16.gmra.mxu1 %vm134_vm0, %v277_v60 }
  0xfe   :  { %v245_v2 = vadd.f32 %v2134_v18, %v244_v1  ;;  %v271_v3 = vmax.f32 %v253_v63, 0.0 }
 0x100   :  { %v269_v5 = vmax.f32 %v245_v2, 0.0  ;;  %v279_v8 = vpack.c.bf16 %v271_v3, %v270_v6 }
 0x102   :  { %v278_v7 = vpack.c.bf16 %v269_v5, %v268_v4 }
 0x104   :  { %2556 = vmatprep.mubr.msk.bf16.mxu1 %vm134_vm0, %v278_v7 }
 0x105   :  { %2557 = vmatmul.mubr.msk.bf16.gmra.mxu1 %vm134_vm0, %v279_v8 }
 0x106   :  { %2648 = vmatprep.mubr.f32.mxu1 %v3376_v9 }
 0x1ad   :  { %v2546_v10 = vpop.f32.mrf.mxu1 }
 0x1ae   :  { %v3433_v40 = vadd.f32 %v2546_v10, %v2155_v24 }
 0x1af   :  { %v377_v11 = vpop.f32.mrf.mxu1 }
 0x1b0   :  { %v3441_v42 = vadd.f32 %v2155_v24, %v377_v11 }
 0x1b1   :  { %v2547_v12 = vpop.f32.mrf.mxu1 }
 0x1b2   :  { %v3429_v39 = vadd.f32 %v2547_v12, %v2155_v24 }
 0x1b3   :  { %v380_v13 = vpop.f32.mrf.mxu1 }
 0x1b4   :  { %v3437_v41 = vadd.f32 %v2155_v24, %v380_v13 }
 0x1b5   :  { %v2550_v14 = vpop.f32.mrf.mxu1 }
 0x1b6   :  { %v3417_v36 = vadd.f32 %v2550_v14, %v2155_v24 }
 0x1b7   :  { %v393_v15 = vpop.f32.mrf.mxu1 }
 0x1b8   :  { %v3425_v38 = vadd.f32 %v2155_v24, %v393_v15 }
 0x1b9   :  { %v2551_v16 = vpop.f32.mrf.mxu1 }
 0x1ba   :  { %v3413_v35 = vadd.f32 %v2551_v16, %v2155_v24 }
 0x1bb   :  { %v396_v17 = vpop.f32.mrf.mxu1 }
 0x1bc   :  { %v3421_v37 = vadd.f32 %v2155_v24, %v396_v17 }
 0x1bd   :  { %v2554_v18 = vpop.f32.mrf.mxu1 }
 0x1be   :  { %v3401_v32 = vadd.f32 %v2554_v18, %v2155_v24 }
 0x1bf   :  { %v409_v19 = vpop.f32.mrf.mxu1 }
 0x1c0   :  { %v3409_v34 = vadd.f32 %v2155_v24, %v409_v19 }
 0x1c1   :  { %v2555_v20 = vpop.f32.mrf.mxu1 }
 0x1c2   :  { %v3397_v31 = vadd.f32 %v2555_v20, %v2155_v24  ;;  %v3519_v20 = vmul.f32 0.1, %v3401_v32 }
 0x1c3   :  { %v412_v21 = vpop.f32.mrf.mxu1 }
 0x1c4   :  { %v3405_v33 = vadd.f32 %v2155_v24, %v412_v21  ;;  %v3515_v18 = vmul.f32 0.1, %v3397_v31 }
 0x1c5   :  { %v2558_v22 = vpop.f32.mrf.mxu1 }
 0x1c6   :  { %v3385_v28 = vadd.f32 %v2558_v22, %v2155_v24  ;;  %v3523_v22 = vmul.f32 0.1, %v3405_v33 }
 0x1c7   :  { %v425_v23 = vpop.f32.mrf.mxu1 }
 0x1c8   :  { %v3393_v30 = vadd.f32 %v2155_v24, %v425_v23  ;;  %v3503_v11 = vmul.f32 0.1, %v3385_v28 }
 0x1c9   :  { %v2559_v25 = vpop.f32.mrf.mxu1 }
 0x1ca   :  { %v3383_v26 = vadd.f32 %v2559_v25, %v2155_v24  ;;  %v3511_v16 = vmul.f32 0.1, %v3393_v30 }
 0x1cb   :  { %v428_v27 = vpop.f32.mrf.mxu1 }
 0x1cc   :  { %2560 = vmatprep.subr.mxu0 %v3383_v26  ;;  %v3389_v29 = vadd.f32 %v2155_v24, %v428_v27  ;;  %v3500_v8 = vmul.f32 0.1, %v3383_v26  ;;  %v3527_v24 = vmul.f32 0.1, %v3409_v34 }
 0x1cd   :  { %2561 = vmatpush3.msra.mxu0 %v3383_v26  ;;  %v3531_v26 = vmul.f32 0.1, %v3413_v35 }
 0x1ce   :  { %2562 = vmatprep.subr.mxu0 %v3385_v28  ;;  %v3507_v14 = vmul.f32 0.1, %v3389_v29 }
 0x1cf   :  { %2563 = vmatpush3.msra.mxu0 %v3385_v28  ;;  %v3535_v28 = vmul.f32 0.1, %v3417_v36 }
 0x1d0   :  { %2564 = vmatprep.subr.mxu0 %v3389_v29 }
 0x1d1   :  { %2565 = vmatpush3.msra.mxu0 %v3389_v29 }
 0x1d2   :  { %2566 = vmatprep.subr.mxu0 %v3393_v30 }
 0x1d3   :  { %2567 = vmatpush3.msra.mxu0 %v3393_v30  ;;  %v3539_v30 = vmul.f32 0.1, %v3421_v37 }
 0x1d4   :  { %2568 = vmatprep.subr.mxu0 %v3397_v31 }
 0x1d5   :  { %2569 = vmatpush3.msra.mxu0 %v3397_v31 }
 0x1d6   :  { %2570 = vmatprep.subr.mxu0 %v3401_v32 }
 0x1d7   :  { %2571 = vmatpush3.msra.mxu0 %v3401_v32  ;;  %v3543_v32 = vmul.f32 0.1, %v3425_v38 }
 0x1d8   :  { %2572 = vmatprep.subr.mxu0 %v3405_v33 }
 0x1d9   :  { %2573 = vmatpush3.msra.mxu0 %v3405_v33 }
 0x1da   :  { %2574 = vmatprep.subr.mxu0 %v3409_v34 }
 0x1db   :  { %2575 = vmatpush3.msra.mxu0 %v3409_v34  ;;  %v3547_v34 = vmul.f32 0.1, %v3429_v39 }
 0x1dc   :  { %2576 = vmatprep.subr.mxu0 %v3413_v35 }
 0x1dd   :  { %2577 = vmatpush3.msra.mxu0 %v3413_v35 }
 0x1de   :  { %2578 = vmatprep.subr.mxu0 %v3417_v36 }
 0x1df   :  { %2579 = vmatpush3.msra.mxu0 %v3417_v36  ;;  %v3551_v36 = vmul.f32 0.1, %v3433_v40 }
 0x1e0   :  { %2580 = vmatprep.subr.mxu0 %v3421_v37 }
 0x1e1   :  { %2581 = vmatpush3.msra.mxu0 %v3421_v37 }
 0x1e2   :  { %2582 = vmatprep.subr.mxu0 %v3425_v38 }
 0x1e3   :  { %2583 = vmatpush3.msra.mxu0 %v3425_v38  ;;  %v3555_v38 = vmul.f32 0.1, %v3437_v41 }
 0x1e4   :  { %2584 = vmatprep.subr.mxu0 %v3429_v39 }
 0x1e5   :  { %2585 = vmatpush3.msra.mxu0 %v3429_v39  ;;  %v3560_v39 = vmul.f32 0.1, %v3441_v42 }
 0x1e6   :  { %2586 = vmatprep.subr.mxu0 %v3433_v40 }
 0x1e7   :  { %2587 = vmatpush3.msra.mxu0 %v3433_v40 }
 0x1e8   :  { %2588 = vmatprep.subr.mxu0 %v3437_v41 }
 0x1e9   :  { %2589 = vmatpush3.msra.mxu0 %v3437_v41 }
 0x1ea   :  { %2590 = vmatprep.subr.mxu0 %v3441_v42 }
 0x1eb   :  { %2591 = vmatpush3.msra.mxu0 %v3441_v42 }
 0x1ec   :  { %2593 = vmatmul.mubr.f32.vlgmr.msra.gmra.mxu0 %v3445_v43 }
 0x1ed   :  { %2595 = vmatprep.mubr.f32.mxu0 %v3448_v44 }
 0x1f0   :  { %2596 = vmatmul.mubr.f32.gmra.mxu0 %v3453_v45 }
 0x1f1   :  { %2598 = vmatprep.mubr.f32.mxu0 %v3455_v46 }
 0x1f4   :  { %2599 = vmatmul.mubr.f32.gmra.mxu0 %v3459_v47 }
 0x1f5   :  { %2601 = vmatprep.mubr.f32.mxu0 %v3461_v48 }
 0x1f8   :  { %2602 = vmatmul.mubr.f32.gmra.mxu0 %v3465_v49 }
 0x1f9   :  { %2604 = vmatprep.mubr.f32.mxu0 %v3467_v50 }
 0x1fc   :  { %2605 = vmatmul.mubr.f32.gmra.mxu0 %v3471_v51 }
 0x1fd   :  { %2607 = vmatprep.mubr.f32.mxu0 %v3473_v52 }
 0x200   :  { %2608 = vmatmul.mubr.f32.gmra.mxu0 %v3477_v53 }
 0x201   :  { %2610 = vmatprep.mubr.f32.mxu0 %v3479_v54 }
 0x204   :  { %2611 = vmatmul.mubr.f32.gmra.mxu0 %v3483_v55 }
 0x205   :  { %2613 = vmatprep.mubr.f32.mxu0 %v3485_v56 }
 0x208   :  { %2614 = vmatmul.mubr.f32.gmra.mxu0 %v3489_v57 }
 0x209   :  { %2704 = vmatprep.mubr.f32.mxu0 %v3376_v9 }
 0x2ac   :  { %v3493_v58 = vpop.f32.mrf.mxu0 }
 0x2ae   :  { %v3495_v59 = vpop.f32.mrf.mxu0 }
 0x2af   :  { %v539_v40 = vadd.f32 %v3495_v59, %v3560_v39 }
 0x2b0   :  { %v2597_v60 = vpop.f32.mrf.mxu0 }
 0x2b1   :  { %v554_v37 = vadd.f32 %v2597_v60, %v3547_v34 }
 0x2b2   :  { %v3497_v61 = vpop.f32.mrf.mxu0 }
 0x2b4   :  { %v2600_v62 = vpop.f32.mrf.mxu0 }
 0x2b5   :  { %v564_v33 = vadd.f32 %v2600_v62, %v3539_v30  ;;  %v549_v62 = vadd.f32 %v3497_v61, %v3551_v36 }
 0x2b6   :  { %v558_v63 = vpop.f32.mrf.mxu0 }
 0x2b7   :  { %v559_v35 = vadd.f32 %v558_v63, %v3543_v32  ;;  %v544_v63 = vadd.f32 %v3493_v58, %v3555_v38 }
 0x2b8   :  { %v2603_v0 = vpop.f32.mrf.mxu0 }
 0x2b9   :  { %v574_v29 = vadd.f32 %v2603_v0, %v3531_v26 }
 0x2ba   :  { %v568_v1 = vpop.f32.mrf.mxu0 }
 0x2bb   :  { %v569_v31 = vadd.f32 %v568_v1, %v3535_v28 }
 0x2bc   :  { %v2606_v2 = vpop.f32.mrf.mxu0 }
 0x2bd   :  { %v584_v25 = vadd.f32 %v2606_v2, %v3523_v22 }
 0x2be   :  { %v578_v3 = vpop.f32.mrf.mxu0 }
 0x2bf   :  { %v579_v27 = vadd.f32 %v578_v3, %v3527_v24 }
 0x2c0   :  { %v2609_v4 = vpop.f32.mrf.mxu0 }
 0x2c1   :  { %v594_v21 = vadd.f32 %v2609_v4, %v3515_v18 }
 0x2c2   :  { %v588_v5 = vpop.f32.mrf.mxu0 }
 0x2c3   :  { %v589_v23 = vadd.f32 %v588_v5, %v3519_v20 }
 0x2c4   :  { %v2612_v6 = vpop.f32.mrf.mxu0 }
 0x2c5   :  { %v604_v17 = vadd.f32 %v2612_v6, %v3507_v14 }
 0x2c6   :  { %v598_v7 = vpop.f32.mrf.mxu0 }
 0x2c7   :  { %v599_v19 = vadd.f32 %v598_v7, %v3511_v16 }
 0x2c8   :  { %v2615_v10 = vpop.f32.mrf.mxu0 }
 0x2c9   :  { %v614_v12 = vadd.f32 %v2615_v10, %v3500_v8 }
 0x2ca   :  { %v608_v13 = vpop.f32.mrf.mxu0 }
 0x2cb   :  { %v609_v15 = vadd.f32 %v608_v13, %v3503_v11  ;;  %2616 = vmatprep.subr.mxu1 %v614_v12 }
 0x2cc   :  { %2617 = vmatpush3.msra.mxu1 %v614_v12 }
 0x2cd   :  { %2618 = vmatprep.subr.mxu1 %v609_v15 }
 0x2ce   :  { %2619 = vmatpush3.msra.mxu1 %v609_v15 }
 0x2cf   :  { %2620 = vmatprep.subr.mxu1 %v604_v17 }
 0x2d0   :  { %2621 = vmatpush3.msra.mxu1 %v604_v17 }
 0x2d1   :  { %2622 = vmatprep.subr.mxu1 %v599_v19 }
 0x2d2   :  { %2623 = vmatpush3.msra.mxu1 %v599_v19 }
 0x2d3   :  { %2624 = vmatprep.subr.mxu1 %v594_v21 }
 0x2d4   :  { %2625 = vmatpush3.msra.mxu1 %v594_v21 }
 0x2d5   :  { %2626 = vmatprep.subr.mxu1 %v589_v23 }
 0x2d6   :  { %2627 = vmatpush3.msra.mxu1 %v589_v23 }
 0x2d7   :  { %2628 = vmatprep.subr.mxu1 %v584_v25 }
 0x2d8   :  { %2629 = vmatpush3.msra.mxu1 %v584_v25 }
 0x2d9   :  { %2630 = vmatprep.subr.mxu1 %v579_v27 }
 0x2da   :  { %2631 = vmatpush3.msra.mxu1 %v579_v27 }
 0x2db   :  { %2632 = vmatprep.subr.mxu1 %v574_v29 }
 0x2dc   :  { %2633 = vmatpush3.msra.mxu1 %v574_v29 }
 0x2dd   :  { %2634 = vmatprep.subr.mxu1 %v569_v31 }
 0x2de   :  { %2635 = vmatpush3.msra.mxu1 %v569_v31 }
 0x2df   :  { %2636 = vmatprep.subr.mxu1 %v564_v33 }
 0x2e0   :  { %2637 = vmatpush3.msra.mxu1 %v564_v33 }
 0x2e1   :  { %2638 = vmatprep.subr.mxu1 %v559_v35 }
 0x2e2   :  { %2639 = vmatpush3.msra.mxu1 %v559_v35 }
 0x2e3   :  { %2640 = vmatprep.subr.mxu1 %v554_v37 }
 0x2e4   :  { %2641 = vmatpush3.msra.mxu1 %v554_v37 }
 0x2e5   :  { %2642 = vmatprep.subr.mxu1 %v549_v62 }
 0x2e6   :  { %2643 = vmatpush3.msra.mxu1 %v549_v62 }
 0x2e7   :  { %2644 = vmatprep.subr.mxu1 %v544_v63 }
 0x2e8   :  { %2645 = vmatpush3.msra.mxu1 %v544_v63 }
 0x2e9   :  { %2646 = vmatprep.subr.mxu1 %v539_v40 }
 0x2ea   :  { %2647 = vmatpush3.msra.mxu1 %v539_v40 }
 0x2eb   :  { %2649 = vmatmul.mubr.f32.vlgmr.msra.gmra.mxu1 %v3445_v43 }
 0x2ec   :  { %2651 = vmatprep.mubr.f32.mxu1 %v3448_v44 }
 0x2ef   :  { %2652 = vmatmul.mubr.f32.gmra.mxu1 %v3453_v45 }
 0x2f0   :  { %2654 = vmatprep.mubr.f32.mxu1 %v3455_v46 }
 0x2f3   :  { %2655 = vmatmul.mubr.f32.gmra.mxu1 %v3459_v47 }
 0x2f4   :  { %2657 = vmatprep.mubr.f32.mxu1 %v3461_v48 }
 0x2f7   :  { %2658 = vmatmul.mubr.f32.gmra.mxu1 %v3465_v49 }
 0x2f8   :  { %2660 = vmatprep.mubr.f32.mxu1 %v3467_v50 }
 0x2fb   :  { %2661 = vmatmul.mubr.f32.gmra.mxu1 %v3471_v51 }
 0x2fc   :  { %2663 = vmatprep.mubr.f32.mxu1 %v3473_v52 }
 0x2ff   :  { %2664 = vmatmul.mubr.f32.gmra.mxu1 %v3477_v53 }
 0x300   :  { %2666 = vmatprep.mubr.f32.mxu1 %v3479_v54 }
 0x303   :  { %2667 = vmatmul.mubr.f32.gmra.mxu1 %v3483_v55 }
 0x304   :  { %2669 = vmatprep.mubr.f32.mxu1 %v3485_v56 }
 0x307   :  { %2670 = vmatmul.mubr.f32.gmra.mxu1 %v3489_v57 }
 0x308   :  { %2760 = vmatprep.mubr.f32.mxu1 %v3376_v9 }
 0x3ab   :  { %v2650_v41 = vpop.f32.mrf.mxu1 }
 0x3ac   :  { %v689_v63 = vadd.f32 %v2650_v41, %v3555_v38 }
 0x3ad   :  { %v683_v42 = vpop.f32.mrf.mxu1 }
 0x3ae   :  { %v684_v40 = vadd.f32 %v683_v42, %v3560_v39 }
 0x3af   :  { %v2653_v58 = vpop.f32.mrf.mxu1 }
 0x3b0   :  { %v699_v37 = vadd.f32 %v2653_v58, %v3547_v34 }
 0x3b1   :  { %v693_v59 = vpop.f32.mrf.mxu1 }
 0x3b2   :  { %v694_v62 = vadd.f32 %v693_v59, %v3551_v36 }
 0x3b3   :  { %v2656_v60 = vpop.f32.mrf.mxu1 }
 0x3b4   :  { %v709_v33 = vadd.f32 %v2656_v60, %v3539_v30 }
 0x3b5   :  { %v703_v61 = vpop.f32.mrf.mxu1 }
 0x3b6   :  { %v704_v35 = vadd.f32 %v703_v61, %v3543_v32 }
 0x3b7   :  { %v2659_v0 = vpop.f32.mrf.mxu1 }
 0x3b8   :  { %v719_v29 = vadd.f32 %v2659_v0, %v3531_v26 }
 0x3b9   :  { %v713_v1 = vpop.f32.mrf.mxu1 }
 0x3ba   :  { %v714_v31 = vadd.f32 %v713_v1, %v3535_v28 }
 0x3bb   :  { %v2662_v2 = vpop.f32.mrf.mxu1 }
 0x3bc   :  { %v729_v25 = vadd.f32 %v2662_v2, %v3523_v22 }
 0x3bd   :  { %v723_v3 = vpop.f32.mrf.mxu1 }
 0x3be   :  { %v724_v27 = vadd.f32 %v723_v3, %v3527_v24 }
 0x3bf   :  { %v2665_v4 = vpop.f32.mrf.mxu1 }
 0x3c0   :  { %v739_v21 = vadd.f32 %v2665_v4, %v3515_v18 }
 0x3c1   :  { %v733_v5 = vpop.f32.mrf.mxu1 }
 0x3c2   :  { %v734_v23 = vadd.f32 %v733_v5, %v3519_v20 }
 0x3c3   :  { %v2668_v6 = vpop.f32.mrf.mxu1 }
 0x3c4   :  { %v749_v17 = vadd.f32 %v2668_v6, %v3507_v14 }
 0x3c5   :  { %v743_v7 = vpop.f32.mrf.mxu1 }
 0x3c6   :  { %v744_v19 = vadd.f32 %v743_v7, %v3511_v16 }
 0x3c7   :  { %v2671_v10 = vpop.f32.mrf.mxu1 }
 0x3c8   :  { %v759_v12 = vadd.f32 %v2671_v10, %v3500_v8 }
 0x3c9   :  { %v753_v13 = vpop.f32.mrf.mxu1 }
 0x3ca   :  { %v754_v15 = vadd.f32 %v753_v13, %v3503_v11  ;;  %2672 = vmatprep.subr.mxu0 %v759_v12 }
 0x3cb   :  { %2673 = vmatpush3.msra.mxu0 %v759_v12 }
 0x3cc   :  { %2674 = vmatprep.subr.mxu0 %v754_v15 }
 0x3cd   :  { %2675 = vmatpush3.msra.mxu0 %v754_v15 }
 0x3ce   :  { %2676 = vmatprep.subr.mxu0 %v749_v17 }
 0x3cf   :  { %2677 = vmatpush3.msra.mxu0 %v749_v17 }
 0x3d0   :  { %2678 = vmatprep.subr.mxu0 %v744_v19 }
 0x3d1   :  { %2679 = vmatpush3.msra.mxu0 %v744_v19 }
 0x3d2   :  { %2680 = vmatprep.subr.mxu0 %v739_v21 }
 0x3d3   :  { %2681 = vmatpush3.msra.mxu0 %v739_v21 }
 0x3d4   :  { %2682 = vmatprep.subr.mxu0 %v734_v23 }
 0x3d5   :  { %2683 = vmatpush3.msra.mxu0 %v734_v23 }
 0x3d6   :  { %2684 = vmatprep.subr.mxu0 %v729_v25 }
 0x3d7   :  { %2685 = vmatpush3.msra.mxu0 %v729_v25 }
 0x3d8   :  { %2686 = vmatprep.subr.mxu0 %v724_v27 }
 0x3d9   :  { %2687 = vmatpush3.msra.mxu0 %v724_v27 }
 0x3da   :  { %2688 = vmatprep.subr.mxu0 %v719_v29 }
 0x3db   :  { %2689 = vmatpush3.msra.mxu0 %v719_v29 }
 0x3dc   :  { %2690 = vmatprep.subr.mxu0 %v714_v31 }
 0x3dd   :  { %2691 = vmatpush3.msra.mxu0 %v714_v31 }
 0x3de   :  { %2692 = vmatprep.subr.mxu0 %v709_v33 }
 0x3df   :  { %2693 = vmatpush3.msra.mxu0 %v709_v33 }
 0x3e0   :  { %2694 = vmatprep.subr.mxu0 %v704_v35 }
 0x3e1   :  { %2695 = vmatpush3.msra.mxu0 %v704_v35 }
 0x3e2   :  { %2696 = vmatprep.subr.mxu0 %v699_v37 }
 0x3e3   :  { %2697 = vmatpush3.msra.mxu0 %v699_v37 }
 0x3e4   :  { %2698 = vmatprep.subr.mxu0 %v694_v62 }
 0x3e5   :  { %2699 = vmatpush3.msra.mxu0 %v694_v62 }
 0x3e6   :  { %2700 = vmatprep.subr.mxu0 %v689_v63 }
 0x3e7   :  { %2701 = vmatpush3.msra.mxu0 %v689_v63 }
 0x3e8   :  { %2702 = vmatprep.subr.mxu0 %v684_v40 }
 0x3e9   :  { %2703 = vmatpush3.msra.mxu0 %v684_v40 }
 0x3ea   :  { %2705 = vmatmul.mubr.f32.vlgmr.msra.gmra.mxu0 %v3445_v43 }
 0x3eb   :  { %2707 = vmatprep.mubr.f32.mxu0 %v3448_v44 }
 0x3ee   :  { %2708 = vmatmul.mubr.f32.gmra.mxu0 %v3453_v45 }
 0x3ef   :  { %2710 = vmatprep.mubr.f32.mxu0 %v3455_v46 }
 0x3f2   :  { %2711 = vmatmul.mubr.f32.gmra.mxu0 %v3459_v47 }
 0x3f3   :  { %2713 = vmatprep.mubr.f32.mxu0 %v3461_v48 }
 0x3f6   :  { %2714 = vmatmul.mubr.f32.gmra.mxu0 %v3465_v49 }
 0x3f7   :  { %2716 = vmatprep.mubr.f32.mxu0 %v3467_v50 }
 0x3fa   :  { %2717 = vmatmul.mubr.f32.gmra.mxu0 %v3471_v51 }
 0x3fb   :  { %2719 = vmatprep.mubr.f32.mxu0 %v3473_v52 }
 0x3fe   :  { %2720 = vmatmul.mubr.f32.gmra.mxu0 %v3477_v53 }
 0x3ff   :  { %2722 = vmatprep.mubr.f32.mxu0 %v3479_v54 }
 0x402   :  { %2723 = vmatmul.mubr.f32.gmra.mxu0 %v3483_v55 }
 0x403   :  { %2725 = vmatprep.mubr.f32.mxu0 %v3485_v56 }
 0x406   :  { %2726 = vmatmul.mubr.f32.gmra.mxu0 %v3489_v57 }
 0x407   :  { %2816 = vmatprep.mubr.f32.mxu0 %v3376_v9 }
 0x4aa   :  { %v2706_v41 = vpop.f32.mrf.mxu0 }
 0x4ab   :  { %v834_v63 = vadd.f32 %v2706_v41, %v3555_v38 }
 0x4ac   :  { %v828_v42 = vpop.f32.mrf.mxu0 }
 0x4ad   :  { %v829_v40 = vadd.f32 %v828_v42, %v3560_v39 }
 0x4ae   :  { %v2709_v58 = vpop.f32.mrf.mxu0 }
 0x4af   :  { %v844_v37 = vadd.f32 %v2709_v58, %v3547_v34 }
 0x4b0   :  { %v838_v59 = vpop.f32.mrf.mxu0 }
 0x4b1   :  { %v839_v62 = vadd.f32 %v838_v59, %v3551_v36 }
 0x4b2   :  { %v2712_v60 = vpop.f32.mrf.mxu0 }
 0x4b3   :  { %v854_v33 = vadd.f32 %v2712_v60, %v3539_v30 }
 0x4b4   :  { %v848_v61 = vpop.f32.mrf.mxu0 }
 0x4b5   :  { %v849_v35 = vadd.f32 %v848_v61, %v3543_v32 }
 0x4b6   :  { %v2715_v0 = vpop.f32.mrf.mxu0 }
 0x4b7   :  { %v864_v29 = vadd.f32 %v2715_v0, %v3531_v26 }
 0x4b8   :  { %v858_v1 = vpop.f32.mrf.mxu0 }
 0x4b9   :  { %v859_v31 = vadd.f32 %v858_v1, %v3535_v28 }
 0x4ba   :  { %v2718_v2 = vpop.f32.mrf.mxu0 }
 0x4bb   :  { %v874_v25 = vadd.f32 %v2718_v2, %v3523_v22 }
 0x4bc   :  { %v868_v3 = vpop.f32.mrf.mxu0 }
 0x4bd   :  { %v869_v27 = vadd.f32 %v868_v3, %v3527_v24 }
 0x4be   :  { %v2721_v4 = vpop.f32.mrf.mxu0 }
 0x4bf   :  { %v884_v21 = vadd.f32 %v2721_v4, %v3515_v18 }
 0x4c0   :  { %v878_v5 = vpop.f32.mrf.mxu0 }
 0x4c1   :  { %v879_v23 = vadd.f32 %v878_v5, %v3519_v20 }
 0x4c2   :  { %v2724_v6 = vpop.f32.mrf.mxu0 }
 0x4c3   :  { %v894_v17 = vadd.f32 %v2724_v6, %v3507_v14 }
 0x4c4   :  { %v888_v7 = vpop.f32.mrf.mxu0 }
 0x4c5   :  { %v889_v19 = vadd.f32 %v888_v7, %v3511_v16 }
 0x4c6   :  { %v2727_v10 = vpop.f32.mrf.mxu0 }
 0x4c7   :  { %v904_v12 = vadd.f32 %v2727_v10, %v3500_v8 }
 0x4c8   :  { %v898_v13 = vpop.f32.mrf.mxu0 }
 0x4c9   :  { %v899_v15 = vadd.f32 %v898_v13, %v3503_v11  ;;  %2728 = vmatprep.subr.mxu1 %v904_v12 }
 0x4ca   :  { %2729 = vmatpush3.msra.mxu1 %v904_v12 }
 0x4cb   :  { %2730 = vmatprep.subr.mxu1 %v899_v15 }
 0x4cc   :  { %2731 = vmatpush3.msra.mxu1 %v899_v15 }
 0x4cd   :  { %2732 = vmatprep.subr.mxu1 %v894_v17 }
 0x4ce   :  { %2733 = vmatpush3.msra.mxu1 %v894_v17 }
 0x4cf   :  { %2734 = vmatprep.subr.mxu1 %v889_v19 }
 0x4d0   :  { %2735 = vmatpush3.msra.mxu1 %v889_v19 }
 0x4d1   :  { %2736 = vmatprep.subr.mxu1 %v884_v21 }
 0x4d2   :  { %2737 = vmatpush3.msra.mxu1 %v884_v21 }
 0x4d3   :  { %2738 = vmatprep.subr.mxu1 %v879_v23 }
 0x4d4   :  { %2739 = vmatpush3.msra.mxu1 %v879_v23 }
 0x4d5   :  { %2740 = vmatprep.subr.mxu1 %v874_v25 }
 0x4d6   :  { %2741 = vmatpush3.msra.mxu1 %v874_v25 }
 0x4d7   :  { %2742 = vmatprep.subr.mxu1 %v869_v27 }
 0x4d8   :  { %2743 = vmatpush3.msra.mxu1 %v869_v27 }
 0x4d9   :  { %2744 = vmatprep.subr.mxu1 %v864_v29 }
 0x4da   :  { %2745 = vmatpush3.msra.mxu1 %v864_v29 }
 0x4db   :  { %2746 = vmatprep.subr.mxu1 %v859_v31 }
 0x4dc   :  { %2747 = vmatpush3.msra.mxu1 %v859_v31 }
 0x4dd   :  { %2748 = vmatprep.subr.mxu1 %v854_v33 }
 0x4de   :  { %2749 = vmatpush3.msra.mxu1 %v854_v33 }
 0x4df   :  { %2750 = vmatprep.subr.mxu1 %v849_v35 }
 0x4e0   :  { %2751 = vmatpush3.msra.mxu1 %v849_v35 }
 0x4e1   :  { %2752 = vmatprep.subr.mxu1 %v844_v37 }
 0x4e2   :  { %2753 = vmatpush3.msra.mxu1 %v844_v37 }
 0x4e3   :  { %2754 = vmatprep.subr.mxu1 %v839_v62 }
 0x4e4   :  { %2755 = vmatpush3.msra.mxu1 %v839_v62 }
 0x4e5   :  { %2756 = vmatprep.subr.mxu1 %v834_v63 }
 0x4e6   :  { %2757 = vmatpush3.msra.mxu1 %v834_v63 }
 0x4e7   :  { %2758 = vmatprep.subr.mxu1 %v829_v40 }
 0x4e8   :  { %2759 = vmatpush3.msra.mxu1 %v829_v40 }
 0x4e9   :  { %2761 = vmatmul.mubr.f32.vlgmr.msra.gmra.mxu1 %v3445_v43 }
 0x4ea   :  { %2763 = vmatprep.mubr.f32.mxu1 %v3448_v44 }
 0x4ed   :  { %2764 = vmatmul.mubr.f32.gmra.mxu1 %v3453_v45 }
 0x4ee   :  { %2766 = vmatprep.mubr.f32.mxu1 %v3455_v46 }
 0x4f1   :  { %2767 = vmatmul.mubr.f32.gmra.mxu1 %v3459_v47 }
 0x4f2   :  { %2769 = vmatprep.mubr.f32.mxu1 %v3461_v48 }
 0x4f5   :  { %2770 = vmatmul.mubr.f32.gmra.mxu1 %v3465_v49 }
 0x4f6   :  { %2772 = vmatprep.mubr.f32.mxu1 %v3467_v50 }
 0x4f9   :  { %2773 = vmatmul.mubr.f32.gmra.mxu1 %v3471_v51 }
 0x4fa   :  { %2775 = vmatprep.mubr.f32.mxu1 %v3473_v52 }
 0x4fd   :  { %2776 = vmatmul.mubr.f32.gmra.mxu1 %v3477_v53 }
 0x4fe   :  { %2778 = vmatprep.mubr.f32.mxu1 %v3479_v54 }
 0x501   :  { %2779 = vmatmul.mubr.f32.gmra.mxu1 %v3483_v55 }
 0x502   :  { %2781 = vmatprep.mubr.f32.mxu1 %v3485_v56 }
 0x505   :  { %2782 = vmatmul.mubr.f32.gmra.mxu1 %v3489_v57 }
 0x506   :  { %2872 = vmatprep.mubr.f32.mxu1 %v3376_v9 }
 0x5a9   :  { %v2762_v41 = vpop.f32.mrf.mxu1 }
 0x5aa   :  { %v979_v63 = vadd.f32 %v2762_v41, %v3555_v38 }
 0x5ab   :  { %v973_v42 = vpop.f32.mrf.mxu1 }
 0x5ac   :  { %v974_v40 = vadd.f32 %v973_v42, %v3560_v39 }
 0x5ad   :  { %v2765_v58 = vpop.f32.mrf.mxu1 }
 0x5ae   :  { %v989_v37 = vadd.f32 %v2765_v58, %v3547_v34 }
 0x5af   :  { %v983_v59 = vpop.f32.mrf.mxu1 }
 0x5b0   :  { %v984_v62 = vadd.f32 %v983_v59, %v3551_v36 }
 0x5b1   :  { %v2768_v60 = vpop.f32.mrf.mxu1 }
 0x5b2   :  { %v999_v33 = vadd.f32 %v2768_v60, %v3539_v30 }
 0x5b3   :  { %v993_v61 = vpop.f32.mrf.mxu1 }
 0x5b4   :  { %v994_v35 = vadd.f32 %v993_v61, %v3543_v32 }
 0x5b5   :  { %v2771_v0 = vpop.f32.mrf.mxu1 }
 0x5b6   :  { %v1009_v29 = vadd.f32 %v2771_v0, %v3531_v26 }
 0x5b7   :  { %v1003_v1 = vpop.f32.mrf.mxu1 }
 0x5b8   :  { %v1004_v31 = vadd.f32 %v1003_v1, %v3535_v28 }
 0x5b9   :  { %v2774_v2 = vpop.f32.mrf.mxu1 }
 0x5ba   :  { %v1019_v25 = vadd.f32 %v2774_v2, %v3523_v22 }
 0x5bb   :  { %v1013_v3 = vpop.f32.mrf.mxu1 }
 0x5bc   :  { %v1014_v27 = vadd.f32 %v1013_v3, %v3527_v24 }
 0x5bd   :  { %v2777_v4 = vpop.f32.mrf.mxu1 }
 0x5be   :  { %v1029_v21 = vadd.f32 %v2777_v4, %v3515_v18 }
 0x5bf   :  { %v1023_v5 = vpop.f32.mrf.mxu1 }
 0x5c0   :  { %v1024_v23 = vadd.f32 %v1023_v5, %v3519_v20 }
 0x5c1   :  { %v2780_v6 = vpop.f32.mrf.mxu1 }
 0x5c2   :  { %v1039_v17 = vadd.f32 %v2780_v6, %v3507_v14 }
 0x5c3   :  { %v1033_v7 = vpop.f32.mrf.mxu1 }
 0x5c4   :  { %v1034_v19 = vadd.f32 %v1033_v7, %v3511_v16 }
 0x5c5   :  { %v2783_v10 = vpop.f32.mrf.mxu1 }
 0x5c6   :  { %v1049_v12 = vadd.f32 %v2783_v10, %v3500_v8 }
 0x5c7   :  { %v1043_v13 = vpop.f32.mrf.mxu1 }
 0x5c8   :  { %v1044_v15 = vadd.f32 %v1043_v13, %v3503_v11  ;;  %2784 = vmatprep.subr.mxu0 %v1049_v12 }
 0x5c9   :  { %2785 = vmatpush3.msra.mxu0 %v1049_v12 }
 0x5ca   :  { %2786 = vmatprep.subr.mxu0 %v1044_v15 }
 0x5cb   :  { %2787 = vmatpush3.msra.mxu0 %v1044_v15 }
 0x5cc   :  { %2788 = vmatprep.subr.mxu0 %v1039_v17 }
 0x5cd   :  { %2789 = vmatpush3.msra.mxu0 %v1039_v17 }
 0x5ce   :  { %2790 = vmatprep.subr.mxu0 %v1034_v19 }
 0x5cf   :  { %2791 = vmatpush3.msra.mxu0 %v1034_v19 }
 0x5d0   :  { %2792 = vmatprep.subr.mxu0 %v1029_v21 }
 0x5d1   :  { %2793 = vmatpush3.msra.mxu0 %v1029_v21 }
 0x5d2   :  { %2794 = vmatprep.subr.mxu0 %v1024_v23 }
 0x5d3   :  { %2795 = vmatpush3.msra.mxu0 %v1024_v23 }
 0x5d4   :  { %2796 = vmatprep.subr.mxu0 %v1019_v25 }
 0x5d5   :  { %2797 = vmatpush3.msra.mxu0 %v1019_v25 }
 0x5d6   :  { %2798 = vmatprep.subr.mxu0 %v1014_v27 }
 0x5d7   :  { %2799 = vmatpush3.msra.mxu0 %v1014_v27 }
 0x5d8   :  { %2800 = vmatprep.subr.mxu0 %v1009_v29 }
 0x5d9   :  { %2801 = vmatpush3.msra.mxu0 %v1009_v29 }
 0x5da   :  { %2802 = vmatprep.subr.mxu0 %v1004_v31 }
 0x5db   :  { %2803 = vmatpush3.msra.mxu0 %v1004_v31 }
 0x5dc   :  { %2804 = vmatprep.subr.mxu0 %v999_v33 }
 0x5dd   :  { %2805 = vmatpush3.msra.mxu0 %v999_v33 }
 0x5de   :  { %2806 = vmatprep.subr.mxu0 %v994_v35 }
 0x5df   :  { %2807 = vmatpush3.msra.mxu0 %v994_v35 }
 0x5e0   :  { %2808 = vmatprep.subr.mxu0 %v989_v37 }
 0x5e1   :  { %2809 = vmatpush3.msra.mxu0 %v989_v37 }
 0x5e2   :  { %2810 = vmatprep.subr.mxu0 %v984_v62 }
 0x5e3   :  { %2811 = vmatpush3.msra.mxu0 %v984_v62 }
 0x5e4   :  { %2812 = vmatprep.subr.mxu0 %v979_v63 }
 0x5e5   :  { %2813 = vmatpush3.msra.mxu0 %v979_v63 }
 0x5e6   :  { %2814 = vmatprep.subr.mxu0 %v974_v40 }
 0x5e7   :  { %2815 = vmatpush3.msra.mxu0 %v974_v40 }
 0x5e8   :  { %2817 = vmatmul.mubr.f32.vlgmr.msra.gmra.mxu0 %v3445_v43 }
 0x5e9   :  { %2819 = vmatprep.mubr.f32.mxu0 %v3448_v44 }
 0x5ec   :  { %2820 = vmatmul.mubr.f32.gmra.mxu0 %v3453_v45 }
 0x5ed   :  { %2822 = vmatprep.mubr.f32.mxu0 %v3455_v46 }
 0x5f0   :  { %2823 = vmatmul.mubr.f32.gmra.mxu0 %v3459_v47 }
 0x5f1   :  { %2825 = vmatprep.mubr.f32.mxu0 %v3461_v48 }
 0x5f4   :  { %2826 = vmatmul.mubr.f32.gmra.mxu0 %v3465_v49 }
 0x5f5   :  { %2828 = vmatprep.mubr.f32.mxu0 %v3467_v50 }
 0x5f8   :  { %2829 = vmatmul.mubr.f32.gmra.mxu0 %v3471_v51 }
 0x5f9   :  { %2831 = vmatprep.mubr.f32.mxu0 %v3473_v52 }
 0x5fc   :  { %2832 = vmatmul.mubr.f32.gmra.mxu0 %v3477_v53 }
 0x5fd   :  { %2834 = vmatprep.mubr.f32.mxu0 %v3479_v54 }
 0x600   :  { %2835 = vmatmul.mubr.f32.gmra.mxu0 %v3483_v55 }
 0x601   :  { %2837 = vmatprep.mubr.f32.mxu0 %v3485_v56 }
 0x604   :  { %2838 = vmatmul.mubr.f32.gmra.mxu0 %v3489_v57 }
 0x605   :  { %2928 = vmatprep.mubr.f32.mxu0 %v3376_v9 }
 0x6a8   :  { %v2818_v41 = vpop.f32.mrf.mxu0 }
 0x6a9   :  { %v1124_v62 = vadd.f32 %v2818_v41, %v3555_v38 }
 0x6aa   :  { %v1118_v42 = vpop.f32.mrf.mxu0 }
 0x6ab   :  { %v1119_v63 = vadd.f32 %v1118_v42, %v3560_v39 }
 0x6ac   :  { %v2821_v58 = vpop.f32.mrf.mxu0 }
 0x6ad   :  { %v1134_v35 = vadd.f32 %v2821_v58, %v3547_v34 }
 0x6ae   :  { %v1128_v59 = vpop.f32.mrf.mxu0 }
 0x6af   :  { %v1129_v37 = vadd.f32 %v1128_v59, %v3551_v36 }
 0x6b0   :  { %v2824_v60 = vpop.f32.mrf.mxu0 }
 0x6b1   :  { %v1144_v31 = vadd.f32 %v2824_v60, %v3539_v30 }
 0x6b2   :  { %v1138_v61 = vpop.f32.mrf.mxu0 }
 0x6b3   :  { %v1139_v33 = vadd.f32 %v1138_v61, %v3543_v32 }
 0x6b4   :  { %v2827_v0 = vpop.f32.mrf.mxu0 }
 0x6b5   :  { %v1154_v27 = vadd.f32 %v2827_v0, %v3531_v26 }
 0x6b6   :  { %v1148_v1 = vpop.f32.mrf.mxu0 }
 0x6b7   :  { %v1149_v29 = vadd.f32 %v1148_v1, %v3535_v28 }
 0x6b8   :  { %v2830_v2 = vpop.f32.mrf.mxu0 }
 0x6b9   :  { %v1164_v23 = vadd.f32 %v2830_v2, %v3523_v22 }
 0x6ba   :  { %v1158_v3 = vpop.f32.mrf.mxu0 }
 0x6bb   :  { %v1159_v25 = vadd.f32 %v1158_v3, %v3527_v24 }
 0x6bc   :  { %v2833_v4 = vpop.f32.mrf.mxu0 }
 0x6bd   :  { %v1174_v19 = vadd.f32 %v2833_v4, %v3515_v18 }
 0x6be   :  { %v1168_v5 = vpop.f32.mrf.mxu0 }
 0x6bf   :  { %v1169_v21 = vadd.f32 %v1168_v5, %v3519_v20 }
 0x6c0   :  { %v2836_v6 = vpop.f32.mrf.mxu0 }
 0x6c1   :  { %v1184_v15 = vadd.f32 %v2836_v6, %v3507_v14 }
 0x6c2   :  { %v1178_v7 = vpop.f32.mrf.mxu0 }
 0x6c3   :  { %v1179_v17 = vadd.f32 %v1178_v7, %v3511_v16 }
 0x6c4   :  { %v2839_v10 = vpop.f32.mrf.mxu0 }
 0x6c5   :  { %v1194_v12 = vadd.f32 %v2839_v10, %v3500_v8 }
 0x6c6   :  { %v1188_v13 = vpop.f32.mrf.mxu0 }
 0x6c7   :  { %v1189_v9 = vadd.f32 %v1188_v13, %v3503_v11  ;;  %2840 = vmatprep.subr.mxu1 %v1194_v12 }
 0x6c8   :  { %2841 = vmatpush3.msra.mxu1 %v1194_v12 }
 0x6c9   :  { %2842 = vmatprep.subr.mxu1 %v1189_v9 }
 0x6ca   :  { %2843 = vmatpush3.msra.mxu1 %v1189_v9 }
 0x6cb   :  { %2844 = vmatprep.subr.mxu1 %v1184_v15 }
 0x6cc   :  { %2845 = vmatpush3.msra.mxu1 %v1184_v15 }
 0x6cd   :  { %2846 = vmatprep.subr.mxu1 %v1179_v17 }
 0x6ce   :  { %2847 = vmatpush3.msra.mxu1 %v1179_v17 }
 0x6cf   :  { %2848 = vmatprep.subr.mxu1 %v1174_v19 }
 0x6d0   :  { %2849 = vmatpush3.msra.mxu1 %v1174_v19 }
 0x6d1   :  { %2850 = vmatprep.subr.mxu1 %v1169_v21 }
 0x6d2   :  { %2851 = vmatpush3.msra.mxu1 %v1169_v21 }
 0x6d3   :  { %2852 = vmatprep.subr.mxu1 %v1164_v23 }
 0x6d4   :  { %2853 = vmatpush3.msra.mxu1 %v1164_v23 }
 0x6d5   :  { %2854 = vmatprep.subr.mxu1 %v1159_v25 }
 0x6d6   :  { %2855 = vmatpush3.msra.mxu1 %v1159_v25 }
 0x6d7   :  { %2856 = vmatprep.subr.mxu1 %v1154_v27 }
 0x6d8   :  { %2857 = vmatpush3.msra.mxu1 %v1154_v27 }
 0x6d9   :  { %2858 = vmatprep.subr.mxu1 %v1149_v29 }
 0x6da   :  { %2859 = vmatpush3.msra.mxu1 %v1149_v29 }
 0x6db   :  { %2860 = vmatprep.subr.mxu1 %v1144_v31 }
 0x6dc   :  { %2861 = vmatpush3.msra.mxu1 %v1144_v31 }
 0x6dd   :  { %2862 = vmatprep.subr.mxu1 %v1139_v33 }
 0x6de   :  { %2863 = vmatpush3.msra.mxu1 %v1139_v33 }
 0x6df   :  { %2864 = vmatprep.subr.mxu1 %v1134_v35 }
 0x6e0   :  { %2865 = vmatpush3.msra.mxu1 %v1134_v35 }
 0x6e1   :  { %2866 = vmatprep.subr.mxu1 %v1129_v37 }
 0x6e2   :  { %2867 = vmatpush3.msra.mxu1 %v1129_v37 }
 0x6e3   :  { %2868 = vmatprep.subr.mxu1 %v1124_v62 }
 0x6e4   :  { %2869 = vmatpush3.msra.mxu1 %v1124_v62  ;;  %v3728_v62 = vld [vmem:[#allocation2 + $0x8] sm:$0xff] }
 0x6e5   :  { %2870 = vmatprep.subr.mxu1 %v1119_v63 }
 0x6e6   :  { %2871 = vmatpush3.msra.mxu1 %v1119_v63  ;;  %v3731_v63 = vld [vmem:[#allocation2 + $0x10] sm:$0xff] }
 0x6e7   :  { %2873 = vmatmul.mubr.f32.vlgmr.msra.gmra.mxu1 %v3445_v43  ;;  %v3709_v43 = vld [vmem:[#allocation2] sm:$0xff] }
 0x6e8   :  { %2875 = vmatprep.mubr.f32.mxu1 %v3448_v44 }
 0x6eb   :  { %2876 = vmatmul.mubr.f32.gmra.mxu1 %v3453_v45 }
 0x6ec   :  { %2878 = vmatprep.mubr.f32.mxu1 %v3455_v46 }
 0x6ef   :  { %2879 = vmatmul.mubr.f32.gmra.mxu1 %v3459_v47 }
 0x6f0   :  { %2881 = vmatprep.mubr.f32.mxu1 %v3461_v48 }
 0x6f3   :  { %2882 = vmatmul.mubr.f32.gmra.mxu1 %v3465_v49 }
 0x6f4   :  { %2884 = vmatprep.mubr.f32.mxu1 %v3467_v50 }
 0x6f7   :  { %2885 = vmatmul.mubr.f32.gmra.mxu1 %v3471_v51 }
 0x6f8   :  { %2887 = vmatprep.mubr.f32.mxu1 %v3473_v52 }
 0x6fb   :  { %2888 = vmatmul.mubr.f32.gmra.mxu1 %v3477_v53 }
 0x6fc   :  { %2890 = vmatprep.mubr.f32.mxu1 %v3479_v54 }
 0x6ff   :  { %2891 = vmatmul.mubr.f32.gmra.mxu1 %v3483_v55 }
 0x700   :  { %2893 = vmatprep.mubr.f32.mxu1 %v3485_v56 }
 0x703   :  { %2894 = vmatmul.mubr.f32.gmra.mxu1 %v3489_v57 }
 0x704   :  { %2984 = vmatprep.mubr.f32.mxu1 %v3709_v43 }
 0x7a7   :  { %v2874_v44 = vpop.f32.mrf.mxu1 }
 0x7a8   :  { %v1269_v35 = vadd.f32 %v2874_v44, %v3555_v38 }
 0x7a9   :  { %v1263_v40 = vpop.f32.mrf.mxu1 }
 0x7aa   :  { %v1264_v37 = vadd.f32 %v1263_v40, %v3560_v39 }
 0x7ab   :  { %v2877_v41 = vpop.f32.mrf.mxu1 }
 0x7ac   :  { %v1279_v31 = vadd.f32 %v2877_v41, %v3547_v34 }
 0x7ad   :  { %v1273_v42 = vpop.f32.mrf.mxu1 }
 0x7ae   :  { %v1274_v33 = vadd.f32 %v1273_v42, %v3551_v36 }
 0x7af   :  { %v2880_v58 = vpop.f32.mrf.mxu1 }
 0x7b0   :  { %v1289_v27 = vadd.f32 %v2880_v58, %v3539_v30 }
 0x7b1   :  { %v1283_v59 = vpop.f32.mrf.mxu1 }
 0x7b2   :  { %v1284_v29 = vadd.f32 %v1283_v59, %v3543_v32 }
 0x7b3   :  { %v2883_v60 = vpop.f32.mrf.mxu1 }
 0x7b4   :  { %v1299_v23 = vadd.f32 %v2883_v60, %v3531_v26 }
 0x7b5   :  { %v1293_v61 = vpop.f32.mrf.mxu1 }
 0x7b6   :  { %v1294_v25 = vadd.f32 %v1293_v61, %v3535_v28 }
 0x7b7   :  { %v2886_v0 = vpop.f32.mrf.mxu1 }
 0x7b8   :  { %v1309_v19 = vadd.f32 %v2886_v0, %v3523_v22 }
 0x7b9   :  { %v1303_v1 = vpop.f32.mrf.mxu1 }
 0x7ba   :  { %v1304_v21 = vadd.f32 %v1303_v1, %v3527_v24 }
 0x7bb   :  { %v2889_v2 = vpop.f32.mrf.mxu1 }
 0x7bc   :  { %v1319_v15 = vadd.f32 %v2889_v2, %v3515_v18 }
 0x7bd   :  { %v1313_v3 = vpop.f32.mrf.mxu1 }
 0x7be   :  { %v1314_v17 = vadd.f32 %v1313_v3, %v3519_v20 }
 0x7bf   :  { %v2892_v4 = vpop.f32.mrf.mxu1 }
 0x7c0   :  { %v1329_v13 = vadd.f32 %v2892_v4, %v3507_v14 }
 0x7c1   :  { %v1323_v5 = vpop.f32.mrf.mxu1 }
 0x7c2   :  { %v1324_v9 = vadd.f32 %v1323_v5, %v3511_v16 }
 0x7c3   :  { %v2895_v6 = vpop.f32.mrf.mxu1 }
 0x7c4   :  { %v1339_v7 = vadd.f32 %v2895_v6, %v3500_v8 }
 0x7c5   :  { %v1333_v10 = vpop.f32.mrf.mxu1 }
 0x7c6   :  { %v1334_v12 = vadd.f32 %v1333_v10, %v3503_v11  ;;  %2896 = vmatprep.subr.mxu0 %v1339_v7 }
 0x7c7   :  { %2897 = vmatpush3.msra.mxu0 %v1339_v7 }
 0x7c8   :  { %2898 = vmatprep.subr.mxu0 %v1334_v12 }
 0x7c9   :  { %2899 = vmatpush3.msra.mxu0 %v1334_v12 }
 0x7ca   :  { %2900 = vmatprep.subr.mxu0 %v1329_v13 }
 0x7cb   :  { %2901 = vmatpush3.msra.mxu0 %v1329_v13 }
 0x7cc   :  { %2902 = vmatprep.subr.mxu0 %v1324_v9 }
 0x7cd   :  { %2903 = vmatpush3.msra.mxu0 %v1324_v9  ;;  %v3766_v9 = vld [vmem:[#allocation2 + $0x18] sm:$0xff] }
 0x7ce   :  { %2904 = vmatprep.subr.mxu0 %v1319_v15 }
 0x7cf   :  { %2905 = vmatpush3.msra.mxu0 %v1319_v15  ;;  %v3769_v15 = vld [vmem:[#allocation2 + $0x20] sm:$0xff] }
 0x7d0   :  { %2906 = vmatprep.subr.mxu0 %v1314_v17 }
 0x7d1   :  { %2907 = vmatpush3.msra.mxu0 %v1314_v17  ;;  %v3772_v17 = vld [vmem:[#allocation2 + $0x28] sm:$0xff] }
 0x7d2   :  { %2908 = vmatprep.subr.mxu0 %v1309_v19 }
 0x7d3   :  { %2909 = vmatpush3.msra.mxu0 %v1309_v19  ;;  %v3775_v19 = vld [vmem:[#allocation2 + $0x30] sm:$0xff] }
 0x7d4   :  { %2910 = vmatprep.subr.mxu0 %v1304_v21 }
 0x7d5   :  { %2911 = vmatpush3.msra.mxu0 %v1304_v21  ;;  %v3778_v21 = vld [vmem:[#allocation2 + $0x38] sm:$0xff] }
 0x7d6   :  { %2912 = vmatprep.subr.mxu0 %v1299_v23 }
 0x7d7   :  { %2913 = vmatpush3.msra.mxu0 %v1299_v23  ;;  %v3781_v23 = vld [vmem:[#allocation2 + $0x40] sm:$0xff] }
 0x7d8   :  { %2914 = vmatprep.subr.mxu0 %v1294_v25 }
 0x7d9   :  { %2915 = vmatpush3.msra.mxu0 %v1294_v25  ;;  %v3784_v25 = vld [vmem:[#allocation2 + $0x48] sm:$0xff] }
 0x7da   :  { %2916 = vmatprep.subr.mxu0 %v1289_v27 }
 0x7db   :  { %2917 = vmatpush3.msra.mxu0 %v1289_v27  ;;  %v3787_v27 = vld [vmem:[#allocation2 + $0x50] sm:$0xff] }
 0x7dc   :  { %2918 = vmatprep.subr.mxu0 %v1284_v29 }
 0x7dd   :  { %2919 = vmatpush3.msra.mxu0 %v1284_v29  ;;  %v3790_v29 = vld [vmem:[#allocation2 + $0x58] sm:$0xff] }
 0x7de   :  { %2920 = vmatprep.subr.mxu0 %v1279_v31 }
 0x7df   :  { %2921 = vmatpush3.msra.mxu0 %v1279_v31  ;;  %v3793_v31 = vld [vmem:[#allocation2 + $0x60] sm:$0xff] }
 0x7e0   :  { %2922 = vmatprep.subr.mxu0 %v1274_v33 }
 0x7e1   :  { %2923 = vmatpush3.msra.mxu0 %v1274_v33  ;;  %v3796_v33 = vld [vmem:[#allocation2 + $0x68] sm:$0xff] }
 0x7e2   :  { %2924 = vmatprep.subr.mxu0 %v1269_v35 }
 0x7e3   :  { %2925 = vmatpush3.msra.mxu0 %v1269_v35  ;;  %v3799_v35 = vld [vmem:[#allocation2 + $0x70] sm:$0xff] }
 0x7e4   :  { %2926 = vmatprep.subr.mxu0 %v1264_v37 }
 0x7e5   :  { %2927 = vmatpush3.msra.mxu0 %v1264_v37  ;;  %v3802_v37 = vld [vmem:[#allocation2 + $0x78] sm:$0xff] }
 0x7e6   :  { %2929 = vmatmul.mubr.f32.vlgmr.msra.gmra.mxu0 %v3728_v62 }
 0x7e7   :  { %2931 = vmatprep.mubr.f32.mxu0 %v3731_v63 }
 0x7ea   :  { %2932 = vmatmul.mubr.f32.gmra.mxu0 %v3453_v45 }
 0x7eb   :  { %2934 = vmatprep.mubr.f32.mxu0 %v3455_v46 }
 0x7ee   :  { %2935 = vmatmul.mubr.f32.gmra.mxu0 %v3459_v47 }
 0x7ef   :  { %2937 = vmatprep.mubr.f32.mxu0 %v3461_v48 }
 0x7f2   :  { %2938 = vmatmul.mubr.f32.gmra.mxu0 %v3465_v49 }
 0x7f3   :  { %2940 = vmatprep.mubr.f32.mxu0 %v3467_v50 }
 0x7f6   :  { %2941 = vmatmul.mubr.f32.gmra.mxu0 %v3471_v51 }
 0x7f7   :  { %2943 = vmatprep.mubr.f32.mxu0 %v3473_v52 }
 0x7fa   :  { %2944 = vmatmul.mubr.f32.gmra.mxu0 %v3477_v53 }
 0x7fb   :  { %2946 = vmatprep.mubr.f32.mxu0 %v3479_v54 }
 0x7fe   :  { %2947 = vmatmul.mubr.f32.gmra.mxu0 %v3483_v55 }
 0x7ff   :  { %2949 = vmatprep.mubr.f32.mxu0 %v3485_v56 }
 0x802   :  { %2950 = vmatmul.mubr.f32.gmra.mxu0 %v3489_v57 }
 0x803   :  { %3040 = vmatprep.mubr.f32.mxu0 %v3709_v43 }
 0x8a6   :  { %v2930_v45 = vpop.f32.mrf.mxu0 }
 0x8a7   :  { %v1414_v12 = vadd.f32 %v2930_v45, %v3555_v38 }
 0x8a8   :  { %v1408_v46 = vpop.f32.mrf.mxu0 }
 0x8a9   :  { %v1409_v13 = vadd.f32 %v1408_v46, %v3560_v39 }
 0x8aa   :  { %v2933_v47 = vpop.f32.mrf.mxu0 }
 0x8ab   :  { %v1424_v7 = vadd.f32 %v2933_v47, %v3547_v34 }
 0x8ac   :  { %v1418_v48 = vpop.f32.mrf.mxu0 }
 0x8ad   :  { %v1419_v10 = vadd.f32 %v1418_v48, %v3551_v36 }
 0x8ae   :  { %v2936_v49 = vpop.f32.mrf.mxu0 }
 0x8af   :  { %v1434_v5 = vadd.f32 %v2936_v49, %v3539_v30 }
 0x8b0   :  { %v1428_v50 = vpop.f32.mrf.mxu0 }
 0x8b1   :  { %v1429_v6 = vadd.f32 %v1428_v50, %v3543_v32 }
 0x8b2   :  { %v2939_v51 = vpop.f32.mrf.mxu0 }
 0x8b3   :  { %v1444_v3 = vadd.f32 %v2939_v51, %v3531_v26 }
 0x8b4   :  { %v1438_v52 = vpop.f32.mrf.mxu0 }
 0x8b5   :  { %v1439_v4 = vadd.f32 %v1438_v52, %v3535_v28 }
 0x8b6   :  { %v2942_v44 = vpop.f32.mrf.mxu0 }
 0x8b7   :  { %v1454_v1 = vadd.f32 %v2942_v44, %v3523_v22 }
 0x8b8   :  { %v1448_v53 = vpop.f32.mrf.mxu0 }
 0x8b9   :  { %v1449_v2 = vadd.f32 %v1448_v53, %v3527_v24 }
 0x8ba   :  { %v2945_v40 = vpop.f32.mrf.mxu0 }
 0x8bb   :  { %v1464_v61 = vadd.f32 %v2945_v40, %v3515_v18 }
 0x8bc   :  { %v1458_v54 = vpop.f32.mrf.mxu0 }
 0x8bd   :  { %v1459_v0 = vadd.f32 %v1458_v54, %v3519_v20 }
 0x8be   :  { %v2948_v41 = vpop.f32.mrf.mxu0 }
 0x8bf   :  { %v1474_v59 = vadd.f32 %v2948_v41, %v3507_v14 }
 0x8c0   :  { %v1468_v55 = vpop.f32.mrf.mxu0 }
 0x8c1   :  { %v1469_v60 = vadd.f32 %v1468_v55, %v3511_v16 }
 0x8c2   :  { %v2951_v42 = vpop.f32.mrf.mxu0 }
 0x8c3   :  { %v1484_v56 = vadd.f32 %v2951_v42, %v3500_v8 }
 0x8c4   :  { %v1478_v57 = vpop.f32.mrf.mxu0 }
 0x8c5   :  { %v1479_v58 = vadd.f32 %v1478_v57, %v3503_v11  ;;  %2952 = vmatprep.subr.mxu1 %v1484_v56 }
 0x8c6   :  { %2953 = vmatpush3.msra.mxu1 %v1484_v56 }
 0x8c7   :  { %2954 = vmatprep.subr.mxu1 %v1479_v58 }
 0x8c8   :  { %2955 = vmatpush3.msra.mxu1 %v1479_v58 }
 0x8c9   :  { %2956 = vmatprep.subr.mxu1 %v1474_v59 }
 0x8ca   :  { %2957 = vmatpush3.msra.mxu1 %v1474_v59 }
 0x8cb   :  { %2958 = vmatprep.subr.mxu1 %v1469_v60 }
 0x8cc   :  { %2959 = vmatpush3.msra.mxu1 %v1469_v60 }
 0x8cd   :  { %2960 = vmatprep.subr.mxu1 %v1464_v61 }
 0x8ce   :  { %2961 = vmatpush3.msra.mxu1 %v1464_v61 }
 0x8cf   :  { %2962 = vmatprep.subr.mxu1 %v1459_v0 }
 0x8d0   :  { %2963 = vmatpush3.msra.mxu1 %v1459_v0 }
 0x8d1   :  { %2964 = vmatprep.subr.mxu1 %v1454_v1 }
 0x8d2   :  { %2965 = vmatpush3.msra.mxu1 %v1454_v1 }
 0x8d3   :  { %2966 = vmatprep.subr.mxu1 %v1449_v2 }
 0x8d4   :  { %2967 = vmatpush3.msra.mxu1 %v1449_v2 }
 0x8d5   :  { %2968 = vmatprep.subr.mxu1 %v1444_v3 }
 0x8d6   :  { %2969 = vmatpush3.msra.mxu1 %v1444_v3 }
 0x8d7   :  { %2970 = vmatprep.subr.mxu1 %v1439_v4 }
 0x8d8   :  { %2971 = vmatpush3.msra.mxu1 %v1439_v4 }
 0x8d9   :  { %2972 = vmatprep.subr.mxu1 %v1434_v5 }
 0x8da   :  { %2973 = vmatpush3.msra.mxu1 %v1434_v5 }
 0x8db   :  { %2974 = vmatprep.subr.mxu1 %v1429_v6 }
 0x8dc   :  { %2975 = vmatpush3.msra.mxu1 %v1429_v6 }
 0x8dd   :  { %2976 = vmatprep.subr.mxu1 %v1424_v7 }
 0x8de   :  { %2977 = vmatpush3.msra.mxu1 %v1424_v7 }
 0x8df   :  { %2978 = vmatprep.subr.mxu1 %v1419_v10 }
 0x8e0   :  { %2979 = vmatpush3.msra.mxu1 %v1419_v10 }
 0x8e1   :  { %2980 = vmatprep.subr.mxu1 %v1414_v12 }
 0x8e2   :  { %2981 = vmatpush3.msra.mxu1 %v1414_v12 }
 0x8e3   :  { %2982 = vmatprep.subr.mxu1 %v1409_v13 }
 0x8e4   :  { %2983 = vmatpush3.msra.mxu1 %v1409_v13 }
 0x8e5   :  { %2985 = vmatmul.mubr.f32.vlgmr.msra.gmra.mxu1 %v3728_v62 }
 0x8e6   :  { %2987 = vmatprep.mubr.f32.mxu1 %v3731_v63 }
 0x8e9   :  { %2988 = vmatmul.mubr.f32.gmra.mxu1 %v3766_v9 }
 0x8ea   :  { %2990 = vmatprep.mubr.f32.mxu1 %v3769_v15 }
 0x8ed   :  { %2991 = vmatmul.mubr.f32.gmra.mxu1 %v3772_v17 }
 0x8ee   :  { %2993 = vmatprep.mubr.f32.mxu1 %v3775_v19 }
 0x8f1   :  { %2994 = vmatmul.mubr.f32.gmra.mxu1 %v3778_v21 }
 0x8f2   :  { %2996 = vmatprep.mubr.f32.mxu1 %v3781_v23 }
 0x8f5   :  { %2997 = vmatmul.mubr.f32.gmra.mxu1 %v3784_v25 }
 0x8f6   :  { %2999 = vmatprep.mubr.f32.mxu1 %v3787_v27 }
 0x8f9   :  { %3000 = vmatmul.mubr.f32.gmra.mxu1 %v3790_v29 }
 0x8fa   :  { %3002 = vmatprep.mubr.f32.mxu1 %v3793_v31 }
 0x8fd   :  { %3003 = vmatmul.mubr.f32.gmra.mxu1 %v3796_v33 }
 0x8fe   :  { %3005 = vmatprep.mubr.f32.mxu1 %v3799_v35 }
 0x901   :  { %3006 = vmatmul.mubr.f32.gmra.mxu1 %v3802_v37 }
 0x902   :  { %3096 = vmatprep.mubr.f32.mxu1 %v3709_v43 }
 0x9a5   :  { %v2986_v45 = vpop.f32.mrf.mxu1 }
 0x9a6   :  { %v1559_v10 = vadd.f32 %v2986_v45, %v3555_v38 }
 0x9a7   :  { %v1553_v46 = vpop.f32.mrf.mxu1 }
 0x9a8   :  { %v1554_v12 = vadd.f32 %v1553_v46, %v3560_v39 }
 0x9a9   :  { %v2989_v47 = vpop.f32.mrf.mxu1 }
 0x9aa   :  { %v1569_v6 = vadd.f32 %v2989_v47, %v3547_v34 }
 0x9ab   :  { %v1563_v48 = vpop.f32.mrf.mxu1 }
 0x9ac   :  { %v1564_v7 = vadd.f32 %v1563_v48, %v3551_v36 }
 0x9ad   :  { %v2992_v49 = vpop.f32.mrf.mxu1 }
 0x9ae   :  { %v1579_v4 = vadd.f32 %v2992_v49, %v3539_v30 }
 0x9af   :  { %v1573_v50 = vpop.f32.mrf.mxu1 }
 0x9b0   :  { %v1574_v5 = vadd.f32 %v1573_v50, %v3543_v32 }
 0x9b1   :  { %v2995_v51 = vpop.f32.mrf.mxu1 }
 0x9b2   :  { %v1589_v2 = vadd.f32 %v2995_v51, %v3531_v26 }
 0x9b3   :  { %v1583_v52 = vpop.f32.mrf.mxu1 }
 0x9b4   :  { %v1584_v3 = vadd.f32 %v1583_v52, %v3535_v28 }
 0x9b5   :  { %v2998_v44 = vpop.f32.mrf.mxu1 }
 0x9b6   :  { %v1599_v0 = vadd.f32 %v2998_v44, %v3523_v22 }
 0x9b7   :  { %v1593_v53 = vpop.f32.mrf.mxu1 }
 0x9b8   :  { %v1594_v1 = vadd.f32 %v1593_v53, %v3527_v24 }
 0x9b9   :  { %v3001_v40 = vpop.f32.mrf.mxu1 }
 0x9ba   :  { %v1609_v60 = vadd.f32 %v3001_v40, %v3515_v18 }
 0x9bb   :  { %v1603_v54 = vpop.f32.mrf.mxu1 }
 0x9bc   :  { %v1604_v61 = vadd.f32 %v1603_v54, %v3519_v20 }
 0x9bd   :  { %v3004_v41 = vpop.f32.mrf.mxu1 }
 0x9be   :  { %v1619_v58 = vadd.f32 %v3004_v41, %v3507_v14 }
 0x9bf   :  { %v1613_v55 = vpop.f32.mrf.mxu1 }
 0x9c0   :  { %v1614_v59 = vadd.f32 %v1613_v55, %v3511_v16 }
 0x9c1   :  { %v3007_v42 = vpop.f32.mrf.mxu1 }
 0x9c2   :  { %v1629_v56 = vadd.f32 %v3007_v42, %v3500_v8 }
 0x9c3   :  { %v1623_v57 = vpop.f32.mrf.mxu1 }
 0x9c4   :  { %v1624_v43 = vadd.f32 %v1623_v57, %v3503_v11  ;;  %3008 = vmatprep.subr.mxu0 %v1629_v56 }
 0x9c5   :  { %3009 = vmatpush3.msra.mxu0 %v1629_v56 }
 0x9c6   :  { %3010 = vmatprep.subr.mxu0 %v1624_v43 }
 0x9c7   :  { %3011 = vmatpush3.msra.mxu0 %v1624_v43 }
 0x9c8   :  { %3012 = vmatprep.subr.mxu0 %v1619_v58 }
 0x9c9   :  { %3013 = vmatpush3.msra.mxu0 %v1619_v58 }
 0x9ca   :  { %3014 = vmatprep.subr.mxu0 %v1614_v59 }
 0x9cb   :  { %3015 = vmatpush3.msra.mxu0 %v1614_v59 }
 0x9cc   :  { %3016 = vmatprep.subr.mxu0 %v1609_v60 }
 0x9cd   :  { %3017 = vmatpush3.msra.mxu0 %v1609_v60 }
 0x9ce   :  { %3018 = vmatprep.subr.mxu0 %v1604_v61 }
 0x9cf   :  { %3019 = vmatpush3.msra.mxu0 %v1604_v61 }
 0x9d0   :  { %3020 = vmatprep.subr.mxu0 %v1599_v0 }
 0x9d1   :  { %3021 = vmatpush3.msra.mxu0 %v1599_v0 }
 0x9d2   :  { %3022 = vmatprep.subr.mxu0 %v1594_v1 }
 0x9d3   :  { %3023 = vmatpush3.msra.mxu0 %v1594_v1 }
 0x9d4   :  { %3024 = vmatprep.subr.mxu0 %v1589_v2 }
 0x9d5   :  { %3025 = vmatpush3.msra.mxu0 %v1589_v2 }
 0x9d6   :  { %3026 = vmatprep.subr.mxu0 %v1584_v3 }
 0x9d7   :  { %3027 = vmatpush3.msra.mxu0 %v1584_v3 }
 0x9d8   :  { %3028 = vmatprep.subr.mxu0 %v1579_v4 }
 0x9d9   :  { %3029 = vmatpush3.msra.mxu0 %v1579_v4 }
 0x9da   :  { %3030 = vmatprep.subr.mxu0 %v1574_v5 }
 0x9db   :  { %3031 = vmatpush3.msra.mxu0 %v1574_v5 }
 0x9dc   :  { %3032 = vmatprep.subr.mxu0 %v1569_v6 }
 0x9dd   :  { %3033 = vmatpush3.msra.mxu0 %v1569_v6 }
 0x9de   :  { %3034 = vmatprep.subr.mxu0 %v1564_v7 }
 0x9df   :  { %3035 = vmatpush3.msra.mxu0 %v1564_v7 }
 0x9e0   :  { %3036 = vmatprep.subr.mxu0 %v1559_v10 }
 0x9e1   :  { %3037 = vmatpush3.msra.mxu0 %v1559_v10 }
 0x9e2   :  { %3038 = vmatprep.subr.mxu0 %v1554_v12 }
 0x9e3   :  { %3039 = vmatpush3.msra.mxu0 %v1554_v12 }
 0x9e4   :  { %3041 = vmatmul.mubr.f32.vlgmr.msra.gmra.mxu0 %v3728_v62 }
 0x9e5   :  { %3043 = vmatprep.mubr.f32.mxu0 %v3731_v63 }
 0x9e8   :  { %3044 = vmatmul.mubr.f32.gmra.mxu0 %v3766_v9 }
 0x9e9   :  { %3046 = vmatprep.mubr.f32.mxu0 %v3769_v15 }
 0x9ec   :  { %3047 = vmatmul.mubr.f32.gmra.mxu0 %v3772_v17 }
 0x9ed   :  { %3049 = vmatprep.mubr.f32.mxu0 %v3775_v19 }
 0x9f0   :  { %3050 = vmatmul.mubr.f32.gmra.mxu0 %v3778_v21 }
 0x9f1   :  { %3052 = vmatprep.mubr.f32.mxu0 %v3781_v23 }
 0x9f4   :  { %3053 = vmatmul.mubr.f32.gmra.mxu0 %v3784_v25 }
 0x9f5   :  { %3055 = vmatprep.mubr.f32.mxu0 %v3787_v27 }
 0x9f8   :  { %3056 = vmatmul.mubr.f32.gmra.mxu0 %v3790_v29 }
 0x9f9   :  { %3058 = vmatprep.mubr.f32.mxu0 %v3793_v31 }
 0x9fc   :  { %3059 = vmatmul.mubr.f32.gmra.mxu0 %v3796_v33 }
 0x9fd   :  { %3061 = vmatprep.mubr.f32.mxu0 %v3799_v35 }
 0xa00   :  { %3062 = vmatmul.mubr.f32.gmra.mxu0 %v3802_v37 }
 0xaa4   :  { %v3042_v13 = vpop.f32.mrf.mxu0 }
 0xaa5   :  { %v1704_v7 = vadd.f32 %v3042_v13, %v3555_v38 }
 0xaa6   :  { %v1698_v45 = vpop.f32.mrf.mxu0 }
 0xaa7   :  { %v1699_v10 = vadd.f32 %v1698_v45, %v3560_v39 }
 0xaa8   :  { %v3045_v46 = vpop.f32.mrf.mxu0 }
 0xaa9   :  { %v1714_v5 = vadd.f32 %v3045_v46, %v3547_v34 }
 0xaaa   :  { %v1708_v47 = vpop.f32.mrf.mxu0 }
 0xaab   :  { %v1709_v6 = vadd.f32 %v1708_v47, %v3551_v36 }
 0xaac   :  { %v3048_v48 = vpop.f32.mrf.mxu0 }
 0xaad   :  { %v1724_v3 = vadd.f32 %v3048_v48, %v3539_v30 }
 0xaae   :  { %v1718_v49 = vpop.f32.mrf.mxu0 }
 0xaaf   :  { %v1719_v4 = vadd.f32 %v1718_v49, %v3543_v32 }
 0xab0   :  { %v3051_v50 = vpop.f32.mrf.mxu0 }
 0xab1   :  { %v1734_v1 = vadd.f32 %v3051_v50, %v3531_v26 }
 0xab2   :  { %v1728_v51 = vpop.f32.mrf.mxu0 }
 0xab3   :  { %v1729_v2 = vadd.f32 %v1728_v51, %v3535_v28 }
 0xab4   :  { %v3054_v52 = vpop.f32.mrf.mxu0 }
 0xab5   :  { %v1744_v61 = vadd.f32 %v3054_v52, %v3523_v22 }
 0xab6   :  { %v1738_v44 = vpop.f32.mrf.mxu0 }
 0xab7   :  { %v1739_v0 = vadd.f32 %v1738_v44, %v3527_v24 }
 0xab8   :  { %v3057_v53 = vpop.f32.mrf.mxu0 }
 0xab9   :  { %v1754_v59 = vadd.f32 %v3057_v53, %v3515_v18 }
 0xaba   :  { %v1748_v40 = vpop.f32.mrf.mxu0 }
 0xabb   :  { %v1749_v60 = vadd.f32 %v1748_v40, %v3519_v20 }
 0xabc   :  { %v3060_v54 = vpop.f32.mrf.mxu0 }
 0xabd   :  { %v1764_v43 = vadd.f32 %v3060_v54, %v3507_v14 }
 0xabe   :  { %v1758_v41 = vpop.f32.mrf.mxu0 }
 0xabf   :  { %v1759_v58 = vadd.f32 %v1758_v41, %v3511_v16 }
 0xac0   :  { %v3063_v55 = vpop.f32.mrf.mxu0 }
 0xac1   :  { %v1774_v42 = vadd.f32 %v3063_v55, %v3500_v8 }
 0xac2   :  { %v1768_v56 = vpop.f32.mrf.mxu0 }
 0xac3   :  { %v1769_v57 = vadd.f32 %v1768_v56, %v3503_v11  ;;  %3064 = vmatprep.subr.mxu1 %v1774_v42 }
 0xac4   :  { %3065 = vmatpush3.msra.mxu1 %v1774_v42 }
 0xac5   :  { %3066 = vmatprep.subr.mxu1 %v1769_v57 }
 0xac6   :  { %3067 = vmatpush3.msra.mxu1 %v1769_v57 }
 0xac7   :  { %3068 = vmatprep.subr.mxu1 %v1764_v43 }
 0xac8   :  { %3069 = vmatpush3.msra.mxu1 %v1764_v43 }
 0xac9   :  { %3070 = vmatprep.subr.mxu1 %v1759_v58 }
 0xaca   :  { %3071 = vmatpush3.msra.mxu1 %v1759_v58 }
 0xacb   :  { %3072 = vmatprep.subr.mxu1 %v1754_v59 }
 0xacc   :  { %3073 = vmatpush3.msra.mxu1 %v1754_v59 }
 0xacd   :  { %3074 = vmatprep.subr.mxu1 %v1749_v60 }
 0xace   :  { %3075 = vmatpush3.msra.mxu1 %v1749_v60 }
 0xacf   :  { %3076 = vmatprep.subr.mxu1 %v1744_v61 }
 0xad0   :  { %3077 = vmatpush3.msra.mxu1 %v1744_v61 }
 0xad1   :  { %3078 = vmatprep.subr.mxu1 %v1739_v0 }
 0xad2   :  { %3079 = vmatpush3.msra.mxu1 %v1739_v0 }
 0xad3   :  { %3080 = vmatprep.subr.mxu1 %v1734_v1 }
 0xad4   :  { %3081 = vmatpush3.msra.mxu1 %v1734_v1 }
 0xad5   :  { %3082 = vmatprep.subr.mxu1 %v1729_v2 }
 0xad6   :  { %3083 = vmatpush3.msra.mxu1 %v1729_v2 }
 0xad7   :  { %3084 = vmatprep.subr.mxu1 %v1724_v3 }
 0xad8   :  { %3085 = vmatpush3.msra.mxu1 %v1724_v3 }
 0xad9   :  { %3086 = vmatprep.subr.mxu1 %v1719_v4 }
 0xada   :  { %3087 = vmatpush3.msra.mxu1 %v1719_v4 }
 0xadb   :  { %3088 = vmatprep.subr.mxu1 %v1714_v5 }
 0xadc   :  { %3089 = vmatpush3.msra.mxu1 %v1714_v5 }
 0xadd   :  { %3090 = vmatprep.subr.mxu1 %v1709_v6 }
 0xade   :  { %3091 = vmatpush3.msra.mxu1 %v1709_v6 }
 0xadf   :  { %3092 = vmatprep.subr.mxu1 %v1704_v7 }
 0xae0   :  { %3093 = vmatpush3.msra.mxu1 %v1704_v7 }
 0xae1   :  { %3094 = vmatprep.subr.mxu1 %v1699_v10 }
 0xae2   :  { %3095 = vmatpush3.msra.mxu1 %v1699_v10 }
 0xae3   :  { %3097 = vmatmul.mubr.f32.vlgmr.msra.gmra.mxu1 %v3728_v62  ;;  %v1922_v62 = vlaneseq }
 0xae4   :  { %3099 = vmatprep.mubr.f32.mxu1 %v3731_v63 }
 0xae5   :  { %v3868_v63 = vand.u32 127, %v1922_v62 }
 0xae7   :  { %3100 = vmatmul.mubr.f32.gmra.mxu1 %v3766_v9  ;;  %vm1924_vm1 = vcmp.lt.s32.totalorder %v3868_v63, 16 }
 0xae8   :  { %3102 = vmatprep.mubr.f32.mxu1 %v3769_v15 }
 0xaeb   :  { %3103 = vmatmul.mubr.f32.gmra.mxu1 %v3772_v17 }
 0xaec   :  { %3105 = vmatprep.mubr.f32.mxu1 %v3775_v19 }
 0xaef   :  { %3106 = vmatmul.mubr.f32.gmra.mxu1 %v3778_v21 }
 0xaf0   :  { %3108 = vmatprep.mubr.f32.mxu1 %v3781_v23 }
 0xaf3   :  { %3109 = vmatmul.mubr.f32.gmra.mxu1 %v3784_v25 }
 0xaf4   :  { %3111 = vmatprep.mubr.f32.mxu1 %v3787_v27 }
 0xaf7   :  { %3112 = vmatmul.mubr.f32.gmra.mxu1 %v3790_v29 }
 0xaf8   :  { %3114 = vmatprep.mubr.f32.mxu1 %v3793_v31 }
 0xafb   :  { %3115 = vmatmul.mubr.f32.gmra.mxu1 %v3796_v33 }
 0xafc   :  { %3117 = vmatprep.mubr.f32.mxu1 %v3799_v35 }
 0xaff   :  { %3118 = vmatmul.mubr.f32.gmra.mxu1 %v3802_v37 }
 0xba3   :  { %v3098_v9 = vpop.f32.mrf.mxu1 }
 0xba4   :  { %v1849_v15 = vadd.f32 %v3098_v9, %v3555_v38 }
 0xba5   :  { %v1843_v17 = vpop.f32.mrf.mxu1 }
 0xba6   :  { %v1844_v19 = vadd.f32 %v1843_v17, %v3560_v39  ;;  %v1926_v21 = vsel %vm1924_vm1, %v1849_v15, -1e+30 }
 0xba7   :  { %1943 = vmax.xlane.f32.xlu0 %v1926_v21  ;;  %v3101_v23 = vpop.f32.mrf.mxu1 }
 0xba8   :  { %v1859_v25 = vadd.f32 %v3101_v23, %v3547_v34  ;;  %v1925_v33 = vsel %vm1924_vm1, %v1844_v19, -1e+30 }
 0xba9   :  { %v1853_v27 = vpop.f32.mrf.mxu1 }
 0xbaa   :  { %v1854_v29 = vadd.f32 %v1853_v27, %v3551_v36  ;;  %v1928_v31 = vsel %vm1924_vm1, %v1859_v25, -1e+30 }
 0xbab   :  { %1947 = vmax.xlane.f32.xlu1 %v1928_v31  ;;  %v3104_v38 = vpop.f32.mrf.mxu1  ;;  %1941 = vmax.xlane.f32.xlu0 %v1925_v33 }
 0xbac   :  { %v1869_v35 = vadd.f32 %v3104_v38, %v3539_v30  ;;  %v1927_v34 = vsel %vm1924_vm1, %v1854_v29, -1e+30 }
 0xbad   :  { %v1863_v39 = vpop.f32.mrf.mxu1 }
 0xbae   :  { %v1864_v37 = vadd.f32 %v1863_v39, %v3543_v32  ;;  %v1930_v47 = vsel %vm1924_vm1, %v1869_v35, -1e+30 }
 0xbaf   :  { %v3107_v12 = vpop.f32.mrf.mxu1  ;;  %1945 = vmax.xlane.f32.xlu1 %v1927_v34 }
 0xbb0   :  { %v1929_v36 = vsel %vm1924_vm1, %v1864_v37, -1e+30  ;;  %v1879_v45 = vadd.f32 %v3107_v12, %v3531_v26 }
 0xbb1   :  { %v1873_v13 = vpop.f32.mrf.mxu1  ;;  %1949 = vmax.xlane.f32.xlu0 %v1929_v36 }
 0xbb2   :  { %v1874_v46 = vadd.f32 %v1873_v13, %v3535_v28  ;;  %v1932_v51 = vsel %vm1924_vm1, %v1879_v45, -1e+30 }
 0xbb3   :  { %v3110_v30 = vpop.f32.mrf.mxu1  ;;  %1951 = vmax.xlane.f32.xlu1 %v1930_v47 }
 0xbb4   :  { %v1931_v32 = vsel %vm1924_vm1, %v1874_v46, -1e+30  ;;  %v1889_v49 = vadd.f32 %v3110_v30, %v3523_v22 }
 0xbb5   :  { %v1883_v48 = vpop.f32.mrf.mxu1  ;;  %1953 = vmax.xlane.f32.xlu0 %v1931_v32 }
 0xbb6   :  { %v1884_v50 = vadd.f32 %v1883_v48, %v3527_v24  ;;  %v1934_v40 = vsel %vm1924_vm1, %v1889_v49, -1e+30 }
 0xbb7   :  { %v3113_v26 = vpop.f32.mrf.mxu1  ;;  %1955 = vmax.xlane.f32.xlu1 %v1932_v51 }
 0xbb8   :  { %v1933_v28 = vsel %vm1924_vm1, %v1884_v50, -1e+30  ;;  %v1899_v44 = vadd.f32 %v3113_v26, %v3515_v18 }
 0xbb9   :  { %v1893_v52 = vpop.f32.mrf.mxu1  ;;  %1957 = vmax.xlane.f32.xlu0 %v1933_v28 }
 0xbba   :  { %v1894_v53 = vadd.f32 %v1893_v52, %v3519_v20  ;;  %v1936_v42 = vsel %vm1924_vm1, %v1899_v44, -1e+30 }
 0xbbb   :  { %v3116_v22 = vpop.f32.mrf.mxu1  ;;  %1959 = vmax.xlane.f32.xlu1 %v1934_v40 }
 0xbbc   :  { %v1935_v24 = vsel %vm1924_vm1, %v1894_v53, -1e+30  ;;  %v1909_v41 = vadd.f32 %v3116_v22, %v3507_v14 }
 0xbbd   :  { %v1903_v54 = vpop.f32.mrf.mxu1  ;;  %1961 = vmax.xlane.f32.xlu0 %v1935_v24 }
 0xbbe   :  { %v1904_v55 = vadd.f32 %v1903_v54, %v3511_v16  ;;  %v3918_v14 = vsel %vm1924_vm1, %v1909_v41, -1e+30 }
 0xbbf   :  { %v3119_v18 = vpop.f32.mrf.mxu1  ;;  %1963 = vmax.xlane.f32.xlu1 %v1936_v42 }
 0xbc0   :  { %v3911_v20 = vsel %vm1924_vm1, %v1904_v55, -1e+30  ;;  %v1919_v57 = vadd.f32 %v3119_v18, %v3500_v8 }
 0xbc1   :  { %v1913_v56 = vpop.f32.mrf.mxu1  ;;  %1965 = vmax.xlane.f32.xlu0 %v3911_v20 }
 0xbc2   :  { %v1914_v43 = vadd.f32 %v1913_v56, %v3503_v11  ;;  %v3928_v58 = vsel %vm1924_vm1, %v1919_v57, -1e+30 }
 0xbc3   :  { %1967 = vmax.xlane.f32.xlu1 %v3918_v14 }
 0xbc4   :  { %v3923_v16 = vsel %vm1924_vm1, %v1914_v43, -1e+30 }
 0xbc5   :  { %1969 = vmax.xlane.f32.xlu0 %v3923_v16 }
 0xbc7   :  { %1971 = vmax.xlane.f32.xlu1 %v3928_v58 }
 0xc30   :  { %v1944_v8 = vpop.xlane.xlu0 %1943 }
 0xc31   :  { %v3931_v11 = vsub.f32 %v1926_v21, %v1944_v8 }
 0xc33   :  { %v1991_v59 = vmul.f32 1.442695, %v3931_v11 }
 0xc34   :  { %v1948_v60 = vpop.xlane.xlu1 %1947  ;;  %v1942_v61 = vpop.xlane.xlu0 %1941 }
 0xc35   :  { %3140 = vpow2.f32 %v1991_v59  ;;  %v3934_v0 = vsub.f32 %v1928_v31, %v1948_v60  ;;  %v3936_v1 = vsub.f32 %v1925_v33, %v1942_v61 }
 0xc37   :  { %v1995_v2 = vmul.f32 1.442695, %v3934_v0  ;;  %v1989_v3 = vmul.f32 1.442695, %v3936_v1 }
 0xc38   :  { %v1946_v4 = vpop.xlane.xlu1 %1945 }
 0xc39   :  { %3142 = vpow2.f32 %v1995_v2  ;;  %v3940_v5 = vsub.f32 %v1927_v34, %v1946_v4 }
 0xc3a   :  { %3144 = vpow2.f32 %v1989_v3  ;;  %v1950_v6 = vpop.xlane.xlu0 %1949 }
 0xc3b   :  { %v1993_v7 = vmul.f32 1.442695, %v3940_v5  ;;  %v3943_v10 = vsub.f32 %v1929_v36, %v1950_v6 }
 0xc3c   :  { %v1952_v62 = vpop.xlane.xlu1 %1951 }
 0xc3d   :  { %3146 = vpow2.f32 %v1993_v7  ;;  %v3945_v63 = vsub.f32 %v1930_v47, %v1952_v62  ;;  %v1997_v9 = vmul.f32 1.442695, %v3943_v10 }
 0xc3e   :  { %v1954_v15 = vpop.xlane.xlu0 %1953 }
 0xc3f   :  { %v1999_v17 = vmul.f32 1.442695, %v3945_v63  ;;  %v3949_v19 = vsub.f32 %v1931_v32, %v1954_v15 }
 0xc40   :  { %v1956_v21 = vpop.xlane.xlu1 %1955 }
 0xc41   :  { %3148 = vpow2.f32 %v1999_v17  ;;  %v3951_v23 = vsub.f32 %v1932_v51, %v1956_v21  ;;  %v2001_v27 = vmul.f32 1.442695, %v3949_v19 }
 0xc42   :  { %v3141_v25 = vpop.eup %3140  ;;  %3150 = vpow2.f32 %v1997_v9  ;;  %v1958_v29 = vpop.xlane.xlu0 %1957 }
 0xc43   :  { %v2003_v31 = vmul.f32 1.442695, %v3951_v23  ;;  %v3955_v33 = vsub.f32 %v1933_v28, %v1958_v29  ;;  %2023 = vadd.xlane.f32.xlu1 %v3141_v25 }
 0xc44   :  { %v1960_v38 = vpop.xlane.xlu1 %1959 }
 0xc45   :  { %3152 = vpow2.f32 %v2003_v31  ;;  %v3957_v39 = vsub.f32 %v1934_v40, %v1960_v38  ;;  %v2005_v37 = vmul.f32 1.442695, %v3955_v33 }
 0xc46   :  { %v3143_v35 = vpop.eup %3142  ;;  %3154 = vpow2.f32 %v2001_v27  ;;  %v1962_v34 = vpop.xlane.xlu0 %1961 }
 0xc47   :  { %v3145_v12 = vpop.eup %3144  ;;  %v2007_v36 = vmul.f32 1.442695, %v3957_v39  ;;  %v3961_v13 = vsub.f32 %v1935_v24, %v1962_v34  ;;  %2027 = vadd.xlane.f32.xlu1 %v3143_v35 }
 0xc48   :  { %2021 = vadd.xlane.f32.xlu0 %v3145_v12  ;;  %v1964_v45 = vpop.xlane.xlu1 %1963 }
 0xc49   :  { %3156 = vpow2.f32 %v2007_v36  ;;  %v3963_v46 = vsub.f32 %v1936_v42, %v1964_v45  ;;  %v2009_v30 = vmul.f32 1.442695, %v3961_v13 }
 0xc4a   :  { %v3147_v47 = vpop.eup %3146  ;;  %3158 = vpow2.f32 %v2005_v37  ;;  %v1966_v32 = vpop.xlane.xlu0 %1965 }
 0xc4b   :  { %v2011_v48 = vmul.f32 1.442695, %v3963_v46  ;;  %v3968_v49 = vsub.f32 %v3911_v20, %v1966_v32 }
 0xc4c   :  { %2025 = vadd.xlane.f32.xlu0 %v3147_v47  ;;  %v1968_v50 = vpop.xlane.xlu1 %1967 }
 0xc4d   :  { %3160 = vpow2.f32 %v2011_v48  ;;  %v3971_v51 = vsub.f32 %v3918_v14, %v1968_v50  ;;  %v2013_v28 = vmul.f32 1.442695, %v3968_v49 }
 0xc4e   :  { %v3149_v26 = vpop.eup %3148  ;;  %3162 = vpow2.f32 %v2009_v30  ;;  %v1970_v52 = vpop.xlane.xlu0 %1969 }
 0xc4f   :  { %v3151_v44 = vpop.eup %3150  ;;  %v2015_v53 = vmul.f32 1.442695, %v3971_v51  ;;  %v3976_v40 = vsub.f32 %v3923_v16, %v1970_v52  ;;  %2031 = vadd.xlane.f32.xlu1 %v3149_v26 }
 0xc50   :  { %2029 = vadd.xlane.f32.xlu0 %v3151_v44  ;;  %v1972_v22 = vpop.xlane.xlu1 %1971 }
 0xc51   :  { %3164 = vpow2.f32 %v2015_v53  ;;  %v3979_v24 = vsub.f32 %v3928_v58, %v1972_v22  ;;  %v2017_v41 = vmul.f32 1.442695, %v3976_v40 }
 0xc52   :  { %v3153_v54 = vpop.eup %3152  ;;  %3166 = vpow2.f32 %v2013_v28 }
 0xc53   :  { %v3155_v55 = vpop.eup %3154  ;;  %v2019_v42 = vmul.f32 1.442695, %v3979_v24  ;;  %2035 = vadd.xlane.f32.xlu1 %v3153_v54 }
 0xc54   :  { %2033 = vadd.xlane.f32.xlu0 %v3155_v55 }
 0xc55   :  { %3168 = vpow2.f32 %v2019_v42 }
 0xc56   :  { %v3157_v18 = vpop.eup %3156  ;;  %3170 = vpow2.f32 %v2017_v41 }
 0xc57   :  { %v3159_v20 = vpop.eup %3158  ;;  %2039 = vadd.xlane.f32.xlu1 %v3157_v18 }
 0xc58   :  { %2037 = vadd.xlane.f32.xlu0 %v3159_v20 }
 0xc5a   :  { %v3161_v56 = vpop.eup %3160 }
 0xc5b   :  { %v3163_v57 = vpop.eup %3162  ;;  %2043 = vadd.xlane.f32.xlu1 %v3161_v56 }
 0xc5c   :  { %2041 = vadd.xlane.f32.xlu0 %v3163_v57 }
 0xc5e   :  { %v3165_v43 = vpop.eup %3164 }
 0xc5f   :  { %v3167_v14 = vpop.eup %3166  ;;  %2047 = vadd.xlane.f32.xlu1 %v3165_v43 }
 0xc60   :  { %2045 = vadd.xlane.f32.xlu0 %v3167_v14 }
 0xc62   :  { %v3169_v16 = vpop.eup %3168 }
 0xc63   :  { %v3171_v58 = vpop.eup %3170  ;;  %2051 = vadd.xlane.f32.xlu1 %v3169_v16 }
 0xc64   :  { %2049 = vadd.xlane.f32.xlu0 %v3171_v58 }
 0xccc   :  { %v2024_v8 = vpop.xlane.xlu1 %2023 }
 0xccd   :  { %3172 = vlog2.f32 %v2024_v8 }
 0xcd0   :  { %v2028_v59 = vpop.xlane.xlu1 %2027 }
 0xcd1   :  { %3174 = vlog2.f32 %v2028_v59  ;;  %v2022_v60 = vpop.xlane.xlu0 %2021 }
 0xcd2   :  { %3176 = vlog2.f32 %v2022_v60 }
 0xcd5   :  { %v2026_v61 = vpop.xlane.xlu0 %2025 }
 0xcd6   :  { %3178 = vlog2.f32 %v2026_v61 }
 0xcd8   :  { %v2032_v2 = vpop.xlane.xlu1 %2031 }
 0xcd9   :  { %3180 = vlog2.f32 %v2032_v2  ;;  %v2030_v3 = vpop.xlane.xlu0 %2029 }
 0xcda   :  { %v3173_v4 = vpop.eup %3172  ;;  %3182 = vlog2.f32 %v2030_v3 }
 0xcdb   :  { %v2056_v6 = vmul.f32 0.6931472, %v3173_v4 }
 0xcdc   :  { %v2036_v7 = vpop.xlane.xlu1 %2035 }
 0xcdd   :  { %v2086_v62 = vsub.f32 %v3931_v11, %v2056_v6  ;;  %3184 = vlog2.f32 %v2036_v7  ;;  %v2034_v9 = vpop.xlane.xlu0 %2033 }
 0xcde   :  { %v3175_v15 = vpop.eup %3174  ;;  %3186 = vlog2.f32 %v2034_v9 }
 0xcdf   :  { %v3177_v17 = vpop.eup %3176  ;;  %2102 = vst [vmem:[#allocation5 + $0x8] sm:$0xff] %v2086_v62  ;;  %v2060_v21 = vmul.f32 0.6931472, %v3175_v15 }
 0xce0   :  { %v2054_v25 = vmul.f32 0.6931472, %v3177_v17  ;;  %v2040_v27 = vpop.xlane.xlu1 %2039 }
 0xce1   :  { %v2088_v29 = vsub.f32 %v3934_v0, %v2060_v21  ;;  %3188 = vlog2.f32 %v2040_v27  ;;  %v2038_v31 = vpop.xlane.xlu0 %2037 }
 0xce2   :  { %v2085_v38 = vsub.f32 %v3936_v1, %v2054_v25  ;;  %3190 = vlog2.f32 %v2038_v31 }
 0xce3   :  { %v3179_v35 = vpop.eup %3178  ;;  %2104 = vst [vmem:[#allocation5 + $0x18] sm:$0xff] %v2088_v29 }
 0xce4   :  { %2101 = vst [vmem:[#allocation5] sm:$0xff] %v2085_v38  ;;  %v2058_v11 = vmul.f32 0.6931472, %v3179_v35  ;;  %v2044_v37 = vpop.xlane.xlu1 %2043 }
 0xce5   :  { %3192 = vlog2.f32 %v2044_v37  ;;  %v2042_v34 = vpop.xlane.xlu0 %2041 }
 0xce6   :  { %v3181_v12 = vpop.eup %3180  ;;  %v2087_v36 = vsub.f32 %v3940_v5, %v2058_v11  ;;  %3194 = vlog2.f32 %v2042_v34 }
 0xce7   :  { %v3183_v45 = vpop.eup %3182  ;;  %v2064_v47 = vmul.f32 0.6931472, %v3181_v12 }
 0xce8   :  { %2103 = vst [vmem:[#allocation5 + $0x10] sm:$0xff] %v2087_v36  ;;  %v2062_v0 = vmul.f32 0.6931472, %v3183_v45  ;;  %v2048_v30 = vpop.xlane.xlu1 %2047 }
 0xce9   :  { %v2090_v32 = vsub.f32 %v3945_v63, %v2064_v47  ;;  %3196 = vlog2.f32 %v2048_v30  ;;  %v2046_v1 = vpop.xlane.xlu0 %2045 }
 0xcea   :  { %v3185_v48 = vpop.eup %3184  ;;  %v2089_v50 = vsub.f32 %v3943_v10, %v2062_v0  ;;  %3198 = vlog2.f32 %v2046_v1 }
 0xceb   :  { %v3187_v26 = vpop.eup %3186  ;;  %2106 = vst [vmem:[#allocation5 + $0x28] sm:$0xff] %v2090_v32  ;;  %v2068_v28 = vmul.f32 0.6931472, %v3185_v48 }
 0xcec   :  { %2105 = vst [vmem:[#allocation5 + $0x20] sm:$0xff] %v2089_v50  ;;  %v2066_v52 = vmul.f32 0.6931472, %v3187_v26  ;;  %v2052_v5 = vpop.xlane.xlu1 %2051 }
 0xced   :  { %v2092_v44 = vsub.f32 %v3951_v23, %v2068_v28  ;;  %3200 = vlog2.f32 %v2052_v5  ;;  %v2050_v53 = vpop.xlane.xlu0 %2049 }
 0xcee   :  { %v3189_v22 = vpop.eup %3188  ;;  %v2091_v54 = vsub.f32 %v3949_v19, %v2066_v52  ;;  %3202 = vlog2.f32 %v2050_v53 }
 0xcef   :  { %v3191_v63 = vpop.eup %3190  ;;  %2108 = vst [vmem:[#allocation5 + $0x38] sm:$0xff] %v2092_v44  ;;  %v2072_v41 = vmul.f32 0.6931472, %v3189_v22 }
 0xcf0   :  { %2107 = vst [vmem:[#allocation5 + $0x30] sm:$0xff] %v2091_v54  ;;  %v2070_v10 = vmul.f32 0.6931472, %v3191_v63 }
 0xcf1   :  { %v2094_v55 = vsub.f32 %v3957_v39, %v2072_v41 }
 0xcf2   :  { %v3193_v42 = vpop.eup %3192  ;;  %v2093_v18 = vsub.f32 %v3955_v33, %v2070_v10 }
 0xcf3   :  { %v3195_v20 = vpop.eup %3194  ;;  %2110 = vst [vmem:[#allocation5 + $0x48] sm:$0xff] %v2094_v55  ;;  %v2076_v56 = vmul.f32 0.6931472, %v3193_v42 }
 0xcf4   :  { %2109 = vst [vmem:[#allocation5 + $0x40] sm:$0xff] %v2093_v18  ;;  %v2074_v23 = vmul.f32 0.6931472, %v3195_v20 }
 0xcf5   :  { %v2096_v57 = vsub.f32 %v3963_v46, %v2076_v56 }
 0xcf6   :  { %v3197_v43 = vpop.eup %3196  ;;  %v2095_v19 = vsub.f32 %v3961_v13, %v2074_v23 }
 0xcf7   :  { %v3199_v14 = vpop.eup %3198  ;;  %2112 = vst [vmem:[#allocation5 + $0x58] sm:$0xff] %v2096_v57  ;;  %v2080_v16 = vmul.f32 0.6931472, %v3197_v43 }
 0xcf8   :  { %2111 = vst [vmem:[#allocation5 + $0x50] sm:$0xff] %v2095_v19  ;;  %v2078_v58 = vmul.f32 0.6931472, %v3199_v14 }
 0xcf9   :  { %v2098_v39 = vsub.f32 %v3971_v51, %v2080_v16 }
 0xcfa   :  { %v3201_v8 = vpop.eup %3200  ;;  %v2097_v33 = vsub.f32 %v3968_v49, %v2078_v58 }
 0xcfb   :  { %v3203_v59 = vpop.eup %3202  ;;  %2114 = vst [vmem:[#allocation5 + $0x68] sm:$0xff] %v2098_v39  ;;  %v2084_v60 = vmul.f32 0.6931472, %v3201_v8 }
 0xcfc   :  { %2113 = vst [vmem:[#allocation5 + $0x60] sm:$0xff] %v2097_v33  ;;  %v2082_v46 = vmul.f32 0.6931472, %v3203_v59 }
 0xcfd   :  { %v2100_v61 = vsub.f32 %v3979_v24, %v2084_v60 }
 0xcfe   :  { %v2099_v13 = vsub.f32 %v3976_v40, %v2082_v46 }
 0xcff   :  { %2116 = vst [vmem:[#allocation5 + $0x78] sm:$0xff] %v2100_v61 }
 0xd00   :  { %2115 = vst [vmem:[#allocation5 + $0x70] sm:$0xff] %v2099_v13 }
 0xd01   :  { %3251 = shalt.err (!%p3248_p9)
}
 0xd02   :  { %2128 = dma.vmem_to_hbm [thread:$0]  %s2123_s12, 2048, %s4011_s6, [#allocation4], %s3265_s24, %s3265_s24, %s3266_s25  }
 0xd03   :  { %3262 = dma.done.wait [#allocation4], 2048  }
 0xd04   :  { %3263 = vsyncadd [#allocation4], 4294965248 }
 0xd05   :  { %2132 = vsyncpa [#allocation3], 1 }
 0xd06   :  { %2133 = vsyncpa [#allocation4], 1 }

</bundles_post_ra>
